<compile_context>
chip_gen: v7x
topology: tpu7x:2x2x1
jax: 0.10.0
libtpu: 0.0.40
codegen_flags: <defaults>
</compile_context>

<pallas_src>
import functools
import math

import jax
import jax.numpy as jnp
from jax.experimental import pallas as pl
from jax.experimental.pallas import tpu as pltpu


LN_EPS = 1e-5


def _block_kernel(x_ref, g1_ref, b1_ref, win_ref, bin_ref, wout_ref, bout_ref,
                  g2_ref, b2_ref, wfc_ref, bfc_ref, wpr_ref, bpr_ref,
                  o_ref, *, n_head, gelu_bf16):
    L, D = x_ref.shape                       # one sequence per grid step
    H = n_head
    hd = D // H

    x = x_ref[...].astype(jnp.float32)       # (L, D) tokens, f32

    # ---- LayerNorm 1 (f32, as in the PyTorch forward) ----
    mu = jnp.mean(x, axis=-1, keepdims=True)
    var = jnp.mean((x - mu) * (x - mu), axis=-1, keepdims=True)
    ln1 = (x - mu) * jax.lax.rsqrt(var + LN_EPS) * g1_ref[...] + b1_ref[...]

    # ---- Packed QKV projection (bf16 MXU inputs, f32 accumulation).
    #      1/sqrt(hd) is already folded into the Q columns of W_in / b_in. ----
    qkv = jnp.dot(ln1.astype(jnp.bfloat16), win_ref[...],
                  preferred_element_type=jnp.float32) + bin_ref[...]   # (L, 3D)
    qkv = qkv.astype(jnp.bfloat16)

    # ---- Multi-head attention: static lane slices per head feed the MXU
    #      directly (no stacks / gathers / transposes); softmax in f32. ----
    ctx_heads = []
    for h in range(H):
        q_h = qkv[:, h * hd:(h + 1) * hd]                 # (L, hd) bf16
        k_h = qkv[:, D + h * hd:D + (h + 1) * hd]
        v_h = qkv[:, 2 * D + h * hd:2 * D + (h + 1) * hd]
        s = jnp.einsum("qd,kd->qk", q_h, k_h,
                       preferred_element_type=jnp.float32)            # (L, L)
        m = jnp.max(s, axis=-1, keepdims=True)
        p = jnp.exp(s - m)
        p = p * pl.reciprocal(jnp.sum(p, axis=-1, keepdims=True), approx=True)
        ctx_heads.append(jnp.dot(p.astype(jnp.bfloat16), v_h,
                                 preferred_element_type=jnp.float32))  # (L, hd)
    ctx = jnp.concatenate(ctx_heads, axis=-1)                          # (L, D)

    attn_out = jnp.dot(ctx.astype(jnp.bfloat16), wout_ref[...],
                       preferred_element_type=jnp.float32) + bout_ref[...]
    x = x + attn_out                         # first residual (f32)

    # ---- LayerNorm 2 ----
    mu2 = jnp.mean(x, axis=-1, keepdims=True)
    var2 = jnp.mean((x - mu2) * (x - mu2), axis=-1, keepdims=True)
    ln2 = (x - mu2) * jax.lax.rsqrt(var2 + LN_EPS) * g2_ref[...] + b2_ref[...]

    # ---- MLP: Linear(D->4D) -> QuickGELU -> Linear(4D->D) ----
    hmid = jnp.dot(ln2.astype(jnp.bfloat16), wfc_ref[...],
                   preferred_element_type=jnp.float32) + bfc_ref[...]  # (L, 4D)
    if gelu_bf16:
        # v6e / v7x: bf16 VPU + EUP — halve elementwise cost on the biggest
        # activation; result is cast to bf16 for the next matmul anyway.
        hb = hmid.astype(jnp.bfloat16)
        hact = hb * jax.nn.sigmoid(1.702 * hb)
    else:
        # v5e and older: no bf16 VPU/EUP — keep QuickGELU in f32.
        hact = (hmid * jax.nn.sigmoid(1.702 * hmid)).astype(jnp.bfloat16)
    y = jnp.dot(hact, wpr_ref[...],
                preferred_element_type=jnp.float32) + bpr_ref[...]

    o_ref[...] = x + y                       # second residual, f32, lane-dense


def _tpu_vmem_capacity_bytes():
    try:
        return int(pltpu.get_tpu_info().vmem_capacity_bytes)
    except Exception:
        return 64 << 20          # conservative (v7x per-TensorCore budget)


def _has_bf16_vector_units():
    """True on v6e / v7x (bf16 VPU + EUP); False on v5 generation and older."""
    try:
        kind = jax.devices()[0].device_kind.lower()
    except Exception:
        return True
    return not any(t in kind for t in ("v2", "v3", "v4", "v5"))


def residual_attention_block(x, params, n_head):
    """x: (L, N, D) float32 (seq-first). Returns (L, N, D) float32."""
    L, N, D = x.shape
    assert D % n_head == 0, "d_model must be divisible by n_head"
    assert D % 128 == 0, "d_model must be a multiple of 128 (TPU lane width)"
    hd = D // n_head

    # ---- Weight prep (one-time, wrapper side): transpose, fold Q scale, bf16 ----
    scale = 1.0 / math.sqrt(hd)
    q_scale = jnp.concatenate([jnp.full((D,), scale, jnp.float32),
                               jnp.ones((2 * D,), jnp.float32)])
    w_in = (params["in_proj_weight"].T * q_scale[None, :]).astype(jnp.bfloat16)  # (D, 3D)
    b_in = (params["in_proj_bias"] * q_scale)[None, :].astype(jnp.float32)       # (1, 3D)
    w_out = params["out_proj_weight"].T.astype(jnp.bfloat16)     # (D, D)
    b_out = params["out_proj_bias"][None, :].astype(jnp.float32)
    w_fc = params["c_fc_weight"].T.astype(jnp.bfloat16)          # (D, 4D)
    b_fc = params["c_fc_bias"][None, :].astype(jnp.float32)
    w_pr = params["c_proj_weight"].T.astype(jnp.bfloat16)        # (4D, D)
    b_pr = params["c_proj_bias"][None, :].astype(jnp.float32)
    g1 = params["ln1_gamma"][None, :].astype(jnp.float32)
    b1 = params["ln1_beta"][None, :].astype(jnp.float32)
    g2 = params["ln2_gamma"][None, :].astype(jnp.float32)
    b2 = params["ln2_beta"][None, :].astype(jnp.float32)

    # Free view (no data movement): each batch element is a contiguous D-wide
    # column block of the (L, N*D) matrix, so the grid can walk the batch with
    # a plain strided rectangular DMA — no HBM transpose in or out.
    x2d = x.reshape(L, N * D)

    # ---- Generation-aware VMEM budget ----
    vmem_cap = _tpu_vmem_capacity_bytes()
    weight_bytes = 2 * (3 * D * D + D * D + 4 * D * D + 4 * D * D)   # bf16 weights
    small_bytes = 4 * (3 * D + D + 4 * D + D + 2 * D + 2 * D)        # f32 biases + LN
    io_bytes = 2 * 2 * L * D * 4                                     # dbl-buffered x/out blocks
    act_bytes = (4 * L * D * 14          # f32 live set: x, ln1, qkv(3), attn, res,
                                         # ln2, hmid(4), y, out
                 + 2 * L * D * 9         # bf16 matmul-input copies (ln, qkv, ctx, hact)
                 + 4 * L * L * 4)        # a few live (L, L) score/prob tiles
    needed = weight_bytes + small_bytes + io_bytes + act_bytes + (8 << 20)
    cap = max(min(vmem_cap - (8 << 20), 100 << 20), 32 << 20)   # ~56 MiB on v7x, <=100 MiB on v5e/v6e
    vmem_limit = int(min(max(needed, 32 << 20), cap))

    vmem_full = pl.BlockSpec(memory_space=pltpu.MemorySpace.VMEM)  # resident, single copy

    kernel = functools.partial(_block_kernel, n_head=n_head,
                               gelu_bf16=_has_bf16_vector_units())

    # Grid = batch; each step processes one full sequence.  The batch axis is
    # fully parallel, so on v7x the (ideally even-length) grid shards across
    # both TensorCores; resident weights are replicated per-core and fit.
    out2d = pl.pallas_call(
        kernel,
        out_shape=jax.ShapeDtypeStruct((L, N * D), jnp.float32),
        grid_spec=pltpu.PrefetchScalarGridSpec(
            num_scalar_prefetch=0,
            grid=(N,),
            in_specs=[
                pl.BlockSpec((L, D), lambda n: (0, n)),   # x: one sequence
                vmem_full, vmem_full,          # g1, b1
                vmem_full, vmem_full,          # w_in, b_in
                vmem_full, vmem_full,          # w_out, b_out
                vmem_full, vmem_full,          # g2, b2
                vmem_full, vmem_full,          # w_fc, b_fc
                vmem_full, vmem_full,          # w_pr, b_pr
            ],
            out_specs=pl.BlockSpec((L, D), lambda n: (0, n)),
        ),
        compiler_params=pltpu.CompilerParams(
            dimension_semantics=("parallel",),
            vmem_limit_bytes=vmem_limit),
    )(x2d, g1, b1, w_in, b_in, w_out, b_out, g2, b2, w_fc, b_fc, w_pr, b_pr)

    return out2d.reshape(L, N, D)


# ---------------- pure-JAX reference (for correctness check) ----------------
def _layernorm(x, g, b):
    mu = jnp.mean(x, axis=-1, keepdims=True)
    var = jnp.mean((x - mu) ** 2, axis=-1, keepdims=True)
    return (x - mu) / jnp.sqrt(var + LN_EPS) * g + b


def reference_block(x, params, n_head):
    L, N, D = x.shape
    hd = D // n_head

    ln1 = _layernorm(x, params["ln1_gamma"], params["ln1_beta"])
    qkv = ln1 @ params["in_proj_weight"].T + params["in_proj_bias"]
    q, k, v = qkv[..., :D], qkv[..., D:2 * D], qkv[..., 2 * D:]

    def split_heads(t):  # (L, N, D) -> (N, H, L, hd)
        return jnp.transpose(t.reshape(L, N, n_head, hd), (1, 2, 0, 3))

    qh, kh, vh = split_heads(q), split_heads(k), split_heads(v)
    s = jnp.einsum("nhqd,nhkd->nhqk", qh, kh) / jnp.sqrt(jnp.float32(hd))
    p = jax.nn.softmax(s, axis=-1)
    ctx = jnp.einsum("nhqk,nhkd->nhqd", p, vh)          # (N, H, L, hd)
    ctx = jnp.transpose(ctx, (2, 0, 1, 3)).reshape(L, N, D)
    attn_out = ctx @ params["out_proj_weight"].T + params["out_proj_bias"]
    x = x + attn_out

    ln2 = _layernorm(x, params["ln2_gamma"], params["ln2_beta"])
    h = ln2 @ params["c_fc_weight"].T + params["c_fc_bias"]
    h = h * jax.nn.sigmoid(1.702 * h)
    y = h @ params["c_proj_weight"].T + params["c_proj_bias"]
    return x + y


def make_params(key, d_model):
    ks = jax.random.split(key, 8)
    std = 0.02
    return {
        "ln1_gamma": jnp.ones((d_model,), jnp.float32),
        "ln1_beta": jnp.zeros((d_model,), jnp.float32),
        "in_proj_weight": std * jax.random.normal(ks[0], (3 * d_model, d_model), jnp.float32),
        "in_proj_bias": std * jax.random.normal(ks[1], (3 * d_model,), jnp.float32),
        "out_proj_weight": std * jax.random.normal(ks[2], (d_model, d_model), jnp.float32),
        "out_proj_bias": std * jax.random.normal(ks[3], (d_model,), jnp.float32),
        "ln2_gamma": jnp.ones((d_model,), jnp.float32),
        "ln2_beta": jnp.zeros((d_model,), jnp.float32),
        "c_fc_weight": std * jax.random.normal(ks[4], (4 * d_model, d_model), jnp.float32),
        "c_fc_bias": std * jax.random.normal(ks[5], (4 * d_model,), jnp.float32),
        "c_proj_weight": std * jax.random.normal(ks[6], (d_model, 4 * d_model), jnp.float32),
        "c_proj_bias": std * jax.random.normal(ks[7], (d_model,), jnp.float32),
    }


if __name__ == "__main__":
    # Small but layout-respecting shapes: L multiple of 8, D multiple of 128,
    # even batch (keeps both v7x TensorCores busy), hd = 32.
    L, N, D, H = 16, 4, 128, 4     # seq, batch, d_model, n_head

    key = jax.random.PRNGKey(0)
    k_x, k_p = jax.random.split(key)
    x = jax.random.normal(k_x, (L, N, D), jnp.float32)
    params = make_params(k_p, D)

    fwd = jax.jit(functools.partial(residual_attention_block, n_head=H))
    out = jax.block_until_ready(fwd(x, params))

    ref = reference_block(x, params, H)
    assert out.shape == (L, N, D)
    err = float(jnp.max(jnp.abs(out - ref)))
    # bf16 matmul inputs (f32 accumulation, f32 LN/softmax/residuals) ->
    # looser tolerance than a pure-f32 pipeline.
    assert jnp.allclose(out, ref, atol=2e-2, rtol=2e-2), f"max abs err {err}"

    print("KERNEL_OK")
</pallas_src>

<mosaic_0001>
module attributes {stable_mosaic.version = 11 : i64} {
  func.func @_block_kernel(%arg0: i32, %arg1: memref<16x128xf32, #tpu.memory_space<vmem>>, %arg2: memref<1x128xf32, #tpu.memory_space<vmem>>, %arg3: memref<1x128xf32, #tpu.memory_space<vmem>>, %arg4: memref<128x384xbf16, #tpu.memory_space<vmem>>, %arg5: memref<1x384xf32, #tpu.memory_space<vmem>>, %arg6: memref<128x128xbf16, #tpu.memory_space<vmem>>, %arg7: memref<1x128xf32, #tpu.memory_space<vmem>>, %arg8: memref<1x128xf32, #tpu.memory_space<vmem>>, %arg9: memref<1x128xf32, #tpu.memory_space<vmem>>, %arg10: memref<128x512xbf16, #tpu.memory_space<vmem>>, %arg11: memref<1x512xf32, #tpu.memory_space<vmem>>, %arg12: memref<512x128xbf16, #tpu.memory_space<vmem>>, %arg13: memref<1x128xf32, #tpu.memory_space<vmem>>, %arg14: memref<16x128xf32, #tpu.memory_space<vmem>>) attributes {dimension_semantics = [#tpu.dimension_semantics<parallel>], iteration_bounds = array<i64: 4>, scalar_prefetch = 0 : i64, scratch_operands = 0 : i64, tpu.core_type = #tpu.core_type<tc>, window_params = [{transform_indices = @transform_0, window_bounds = array<i64: 16, 128>}, {pipeline_mode = #tpu.pipeline_mode<synchronous>, transform_indices = @transform_1, window_bounds = array<i64: 1, 128>}, {pipeline_mode = #tpu.pipeline_mode<synchronous>, transform_indices = @transform_2, window_bounds = array<i64: 1, 128>}, {pipeline_mode = #tpu.pipeline_mode<synchronous>, transform_indices = @transform_3, window_bounds = array<i64: 128, 384>}, {pipeline_mode = #tpu.pipeline_mode<synchronous>, transform_indices = @transform_4, window_bounds = array<i64: 1, 384>}, {pipeline_mode = #tpu.pipeline_mode<synchronous>, transform_indices = @transform_5, window_bounds = array<i64: 128, 128>}, {pipeline_mode = #tpu.pipeline_mode<synchronous>, transform_indices = @transform_6, window_bounds = array<i64: 1, 128>}, {pipeline_mode = #tpu.pipeline_mode<synchronous>, transform_indices = @transform_7, window_bounds = array<i64: 1, 128>}, {pipeline_mode = #tpu.pipeline_mode<synchronous>, transform_indices = @transform_8, window_bounds = array<i64: 1, 128>}, {pipeline_mode = #tpu.pipeline_mode<synchronous>, transform_indices = @transform_9, window_bounds = array<i64: 128, 512>}, {pipeline_mode = #tpu.pipeline_mode<synchronous>, transform_indices = @transform_10, window_bounds = array<i64: 1, 512>}, {pipeline_mode = #tpu.pipeline_mode<synchronous>, transform_indices = @transform_11, window_bounds = array<i64: 512, 128>}, {pipeline_mode = #tpu.pipeline_mode<synchronous>, transform_indices = @transform_12, window_bounds = array<i64: 1, 128>}, {transform_indices = @transform_13, window_bounds = array<i64: 16, 128>}]} {
    %c0 = arith.constant 0 : index
    %c0_0 = arith.constant 0 : index
    %0 = vector.load %arg1[%c0, %c0_0] : memref<16x128xf32, #tpu.memory_space<vmem>>, vector<16x128xf32>
    %cst = arith.constant dense<0.000000e+00> : vector<16xf32>
    %1 = vector.multi_reduction <add>, %0, %cst [1] : vector<16x128xf32> to vector<16xf32>
    %2 = vector.shape_cast %1 : vector<16xf32> to vector<16x1xf32>
    %cst_1 = arith.constant 1.280000e+02 : f32
    %3 = vector.broadcast %cst_1 : f32 to vector<16x1xf32>
    %4 = arith.divf %2, %3 : vector<16x1xf32>
    %5 = vector.broadcast %4 : vector<16x1xf32> to vector<16x128xf32>
    %6 = arith.subf %0, %5 : vector<16x128xf32>
    %7 = vector.broadcast %4 : vector<16x1xf32> to vector<16x128xf32>
    %8 = arith.subf %0, %7 : vector<16x128xf32>
    %9 = arith.mulf %6, %8 : vector<16x128xf32>
    %cst_2 = arith.constant dense<0.000000e+00> : vector<16xf32>
    %10 = vector.multi_reduction <add>, %9, %cst_2 [1] : vector<16x128xf32> to vector<16xf32>
    %11 = vector.shape_cast %10 : vector<16xf32> to vector<16x1xf32>
    %cst_3 = arith.constant 1.280000e+02 : f32
    %12 = vector.broadcast %cst_3 : f32 to vector<16x1xf32>
    %13 = arith.divf %11, %12 : vector<16x1xf32>
    %14 = vector.broadcast %4 : vector<16x1xf32> to vector<16x128xf32>
    %15 = arith.subf %0, %14 : vector<16x128xf32>
    %cst_4 = arith.constant 9.99999974E-6 : f32
    %16 = vector.broadcast %cst_4 : f32 to vector<16x1xf32>
    %17 = arith.addf %13, %16 : vector<16x1xf32>
    %18 = math.rsqrt %17 : vector<16x1xf32>
    %19 = vector.broadcast %18 : vector<16x1xf32> to vector<16x128xf32>
    %20 = arith.mulf %15, %19 : vector<16x128xf32>
    %c0_5 = arith.constant 0 : index
    %c0_6 = arith.constant 0 : index
    %21 = vector.load %arg2[%c0_5, %c0_6] : memref<1x128xf32, #tpu.memory_space<vmem>>, vector<1x128xf32>
    %22 = vector.broadcast %21 : vector<1x128xf32> to vector<16x128xf32>
    %23 = arith.mulf %20, %22 : vector<16x128xf32>
    %c0_7 = arith.constant 0 : index
    %c0_8 = arith.constant 0 : index
    %24 = vector.load %arg3[%c0_7, %c0_8] : memref<1x128xf32, #tpu.memory_space<vmem>>, vector<1x128xf32>
    %25 = vector.broadcast %24 : vector<1x128xf32> to vector<16x128xf32>
    %26 = arith.addf %23, %25 : vector<16x128xf32>
    %27 = arith.truncf %26 : vector<16x128xf32> to vector<16x128xbf16>
    %c0_9 = arith.constant 0 : index
    %c0_10 = arith.constant 0 : index
    %28 = vector.load %arg4[%c0_9, %c0_10] : memref<128x384xbf16, #tpu.memory_space<vmem>>, vector<128x384xbf16>
    %cst_11 = arith.constant dense<0.000000e+00> : vector<16x384xf32>
    %29 = tpu.matmul %27, %28, %cst_11 {dimension_numbers = #tpu.dot_dimension_numbers<[1], [0], [0], [1], [0, 0, 1, 1], [], []>} : vector<16x128xbf16>, vector<128x384xbf16>, vector<16x384xf32> -> vector<16x384xf32>
    %c0_12 = arith.constant 0 : index
    %c0_13 = arith.constant 0 : index
    %30 = vector.load %arg5[%c0_12, %c0_13] : memref<1x384xf32, #tpu.memory_space<vmem>>, vector<1x384xf32>
    %31 = vector.broadcast %30 : vector<1x384xf32> to vector<16x384xf32>
    %32 = arith.addf %29, %31 : vector<16x384xf32>
    %33 = arith.truncf %32 : vector<16x384xf32> to vector<16x384xbf16>
    %34 = vector.extract_strided_slice %33 {offsets = [0, 0], sizes = [16, 32], strides = [1, 1]} : vector<16x384xbf16> to vector<16x32xbf16>
    %35 = vector.extract_strided_slice %33 {offsets = [0, 128], sizes = [16, 32], strides = [1, 1]} : vector<16x384xbf16> to vector<16x32xbf16>
    %36 = vector.extract_strided_slice %33 {offsets = [0, 256], sizes = [16, 32], strides = [1, 1]} : vector<16x384xbf16> to vector<16x32xbf16>
    "tpu.trace_start"() <{level = 10 : i32, message = "qd,kd->qk"}> : () -> ()
    %cst_14 = arith.constant dense<0.000000e+00> : vector<16x16xf32>
    %37 = tpu.matmul %34, %35, %cst_14 {dimension_numbers = #tpu.dot_dimension_numbers<[1], [1], [0], [0], [0, 0, 1, 0], [], []>} : vector<16x32xbf16>, vector<16x32xbf16>, vector<16x16xf32> -> vector<16x16xf32>
    "tpu.trace_stop"() : () -> ()
    %cst_15 = arith.constant dense<0xFF800000> : vector<16xf32>
    %38 = vector.multi_reduction <maximumf>, %37, %cst_15 [1] : vector<16x16xf32> to vector<16xf32>
    %39 = vector.shape_cast %38 : vector<16xf32> to vector<16x1xf32>
    %40 = vector.broadcast %39 : vector<16x1xf32> to vector<16x16xf32>
    %41 = arith.subf %37, %40 : vector<16x16xf32>
    %42 = math.exp %41 : vector<16x16xf32>
    %cst_16 = arith.constant dense<0.000000e+00> : vector<16xf32>
    %43 = vector.multi_reduction <add>, %42, %cst_16 [1] : vector<16x16xf32> to vector<16xf32>
    %44 = vector.shape_cast %43 : vector<16xf32> to vector<16x1xf32>
    %45 = tpu.reciprocal %44 {approx = true} : vector<16x1xf32> -> vector<16x1xf32>
    %46 = vector.broadcast %45 : vector<16x1xf32> to vector<16x16xf32>
    %47 = arith.mulf %42, %46 : vector<16x16xf32>
    %48 = arith.truncf %47 : vector<16x16xf32> to vector<16x16xbf16>
    %cst_17 = arith.constant dense<0.000000e+00> : vector<16x32xf32>
    %49 = tpu.matmul %48, %36, %cst_17 {dimension_numbers = #tpu.dot_dimension_numbers<[1], [0], [0], [1], [0, 0, 1, 1], [], []>} : vector<16x16xbf16>, vector<16x32xbf16>, vector<16x32xf32> -> vector<16x32xf32>
    %50 = vector.extract_strided_slice %33 {offsets = [0, 32], sizes = [16, 32], strides = [1, 1]} : vector<16x384xbf16> to vector<16x32xbf16>
    %51 = vector.extract_strided_slice %33 {offsets = [0, 160], sizes = [16, 32], strides = [1, 1]} : vector<16x384xbf16> to vector<16x32xbf16>
    %52 = vector.extract_strided_slice %33 {offsets = [0, 288], sizes = [16, 32], strides = [1, 1]} : vector<16x384xbf16> to vector<16x32xbf16>
    "tpu.trace_start"() <{level = 10 : i32, message = "qd,kd->qk"}> : () -> ()
    %cst_18 = arith.constant dense<0.000000e+00> : vector<16x16xf32>
    %53 = tpu.matmul %50, %51, %cst_18 {dimension_numbers = #tpu.dot_dimension_numbers<[1], [1], [0], [0], [0, 0, 1, 0], [], []>} : vector<16x32xbf16>, vector<16x32xbf16>, vector<16x16xf32> -> vector<16x16xf32>
    "tpu.trace_stop"() : () -> ()
    %cst_19 = arith.constant dense<0xFF800000> : vector<16xf32>
    %54 = vector.multi_reduction <maximumf>, %53, %cst_19 [1] : vector<16x16xf32> to vector<16xf32>
    %55 = vector.shape_cast %54 : vector<16xf32> to vector<16x1xf32>
    %56 = vector.broadcast %55 : vector<16x1xf32> to vector<16x16xf32>
    %57 = arith.subf %53, %56 : vector<16x16xf32>
    %58 = math.exp %57 : vector<16x16xf32>
    %cst_20 = arith.constant dense<0.000000e+00> : vector<16xf32>
    %59 = vector.multi_reduction <add>, %58, %cst_20 [1] : vector<16x16xf32> to vector<16xf32>
    %60 = vector.shape_cast %59 : vector<16xf32> to vector<16x1xf32>
    %61 = tpu.reciprocal %60 {approx = true} : vector<16x1xf32> -> vector<16x1xf32>
    %62 = vector.broadcast %61 : vector<16x1xf32> to vector<16x16xf32>
    %63 = arith.mulf %58, %62 : vector<16x16xf32>
    %64 = arith.truncf %63 : vector<16x16xf32> to vector<16x16xbf16>
    %cst_21 = arith.constant dense<0.000000e+00> : vector<16x32xf32>
    %65 = tpu.matmul %64, %52, %cst_21 {dimension_numbers = #tpu.dot_dimension_numbers<[1], [0], [0], [1], [0, 0, 1, 1], [], []>} : vector<16x16xbf16>, vector<16x32xbf16>, vector<16x32xf32> -> vector<16x32xf32>
    %66 = vector.extract_strided_slice %33 {offsets = [0, 64], sizes = [16, 32], strides = [1, 1]} : vector<16x384xbf16> to vector<16x32xbf16>
    %67 = vector.extract_strided_slice %33 {offsets = [0, 192], sizes = [16, 32], strides = [1, 1]} : vector<16x384xbf16> to vector<16x32xbf16>
    %68 = vector.extract_strided_slice %33 {offsets = [0, 320], sizes = [16, 32], strides = [1, 1]} : vector<16x384xbf16> to vector<16x32xbf16>
    "tpu.trace_start"() <{level = 10 : i32, message = "qd,kd->qk"}> : () -> ()
    %cst_22 = arith.constant dense<0.000000e+00> : vector<16x16xf32>
    %69 = tpu.matmul %66, %67, %cst_22 {dimension_numbers = #tpu.dot_dimension_numbers<[1], [1], [0], [0], [0, 0, 1, 0], [], []>} : vector<16x32xbf16>, vector<16x32xbf16>, vector<16x16xf32> -> vector<16x16xf32>
    "tpu.trace_stop"() : () -> ()
    %cst_23 = arith.constant dense<0xFF800000> : vector<16xf32>
    %70 = vector.multi_reduction <maximumf>, %69, %cst_23 [1] : vector<16x16xf32> to vector<16xf32>
    %71 = vector.shape_cast %70 : vector<16xf32> to vector<16x1xf32>
    %72 = vector.broadcast %71 : vector<16x1xf32> to vector<16x16xf32>
    %73 = arith.subf %69, %72 : vector<16x16xf32>
    %74 = math.exp %73 : vector<16x16xf32>
    %cst_24 = arith.constant dense<0.000000e+00> : vector<16xf32>
    %75 = vector.multi_reduction <add>, %74, %cst_24 [1] : vector<16x16xf32> to vector<16xf32>
    %76 = vector.shape_cast %75 : vector<16xf32> to vector<16x1xf32>
    %77 = tpu.reciprocal %76 {approx = true} : vector<16x1xf32> -> vector<16x1xf32>
    %78 = vector.broadcast %77 : vector<16x1xf32> to vector<16x16xf32>
    %79 = arith.mulf %74, %78 : vector<16x16xf32>
    %80 = arith.truncf %79 : vector<16x16xf32> to vector<16x16xbf16>
    %cst_25 = arith.constant dense<0.000000e+00> : vector<16x32xf32>
    %81 = tpu.matmul %80, %68, %cst_25 {dimension_numbers = #tpu.dot_dimension_numbers<[1], [0], [0], [1], [0, 0, 1, 1], [], []>} : vector<16x16xbf16>, vector<16x32xbf16>, vector<16x32xf32> -> vector<16x32xf32>
    %82 = vector.extract_strided_slice %33 {offsets = [0, 96], sizes = [16, 32], strides = [1, 1]} : vector<16x384xbf16> to vector<16x32xbf16>
    %83 = vector.extract_strided_slice %33 {offsets = [0, 224], sizes = [16, 32], strides = [1, 1]} : vector<16x384xbf16> to vector<16x32xbf16>
    %84 = vector.extract_strided_slice %33 {offsets = [0, 352], sizes = [16, 32], strides = [1, 1]} : vector<16x384xbf16> to vector<16x32xbf16>
    "tpu.trace_start"() <{level = 10 : i32, message = "qd,kd->qk"}> : () -> ()
    %cst_26 = arith.constant dense<0.000000e+00> : vector<16x16xf32>
    %85 = tpu.matmul %82, %83, %cst_26 {dimension_numbers = #tpu.dot_dimension_numbers<[1], [1], [0], [0], [0, 0, 1, 0], [], []>} : vector<16x32xbf16>, vector<16x32xbf16>, vector<16x16xf32> -> vector<16x16xf32>
    "tpu.trace_stop"() : () -> ()
    %cst_27 = arith.constant dense<0xFF800000> : vector<16xf32>
    %86 = vector.multi_reduction <maximumf>, %85, %cst_27 [1] : vector<16x16xf32> to vector<16xf32>
    %87 = vector.shape_cast %86 : vector<16xf32> to vector<16x1xf32>
    %88 = vector.broadcast %87 : vector<16x1xf32> to vector<16x16xf32>
    %89 = arith.subf %85, %88 : vector<16x16xf32>
    %90 = math.exp %89 : vector<16x16xf32>
    %cst_28 = arith.constant dense<0.000000e+00> : vector<16xf32>
    %91 = vector.multi_reduction <add>, %90, %cst_28 [1] : vector<16x16xf32> to vector<16xf32>
    %92 = vector.shape_cast %91 : vector<16xf32> to vector<16x1xf32>
    %93 = tpu.reciprocal %92 {approx = true} : vector<16x1xf32> -> vector<16x1xf32>
    %94 = vector.broadcast %93 : vector<16x1xf32> to vector<16x16xf32>
    %95 = arith.mulf %90, %94 : vector<16x16xf32>
    %96 = arith.truncf %95 : vector<16x16xf32> to vector<16x16xbf16>
    %cst_29 = arith.constant dense<0.000000e+00> : vector<16x32xf32>
    %97 = tpu.matmul %96, %84, %cst_29 {dimension_numbers = #tpu.dot_dimension_numbers<[1], [0], [0], [1], [0, 0, 1, 1], [], []>} : vector<16x16xbf16>, vector<16x32xbf16>, vector<16x32xf32> -> vector<16x32xf32>
    %98 = tpu.concatenate %49, %65, %81, %97 in 1 : vector<16x32xf32>, vector<16x32xf32>, vector<16x32xf32>, vector<16x32xf32> -> vector<16x128xf32>
    %99 = arith.truncf %98 : vector<16x128xf32> to vector<16x128xbf16>
    %c0_30 = arith.constant 0 : index
    %c0_31 = arith.constant 0 : index
    %100 = vector.load %arg6[%c0_30, %c0_31] : memref<128x128xbf16, #tpu.memory_space<vmem>>, vector<128x128xbf16>
    %cst_32 = arith.constant dense<0.000000e+00> : vector<16x128xf32>
    %101 = tpu.matmul %99, %100, %cst_32 {dimension_numbers = #tpu.dot_dimension_numbers<[1], [0], [0], [1], [0, 0, 1, 1], [], []>} : vector<16x128xbf16>, vector<128x128xbf16>, vector<16x128xf32> -> vector<16x128xf32>
    %c0_33 = arith.constant 0 : index
    %c0_34 = arith.constant 0 : index
    %102 = vector.load %arg7[%c0_33, %c0_34] : memref<1x128xf32, #tpu.memory_space<vmem>>, vector<1x128xf32>
    %103 = vector.broadcast %102 : vector<1x128xf32> to vector<16x128xf32>
    %104 = arith.addf %101, %103 : vector<16x128xf32>
    %105 = arith.addf %0, %104 : vector<16x128xf32>
    %cst_35 = arith.constant dense<0.000000e+00> : vector<16xf32>
    %106 = vector.multi_reduction <add>, %105, %cst_35 [1] : vector<16x128xf32> to vector<16xf32>
    %107 = vector.shape_cast %106 : vector<16xf32> to vector<16x1xf32>
    %cst_36 = arith.constant 1.280000e+02 : f32
    %108 = vector.broadcast %cst_36 : f32 to vector<16x1xf32>
    %109 = arith.divf %107, %108 : vector<16x1xf32>
    %110 = vector.broadcast %109 : vector<16x1xf32> to vector<16x128xf32>
    %111 = arith.subf %105, %110 : vector<16x128xf32>
    %112 = vector.broadcast %109 : vector<16x1xf32> to vector<16x128xf32>
    %113 = arith.subf %105, %112 : vector<16x128xf32>
    %114 = arith.mulf %111, %113 : vector<16x128xf32>
    %cst_37 = arith.constant dense<0.000000e+00> : vector<16xf32>
    %115 = vector.multi_reduction <add>, %114, %cst_37 [1] : vector<16x128xf32> to vector<16xf32>
    %116 = vector.shape_cast %115 : vector<16xf32> to vector<16x1xf32>
    %cst_38 = arith.constant 1.280000e+02 : f32
    %117 = vector.broadcast %cst_38 : f32 to vector<16x1xf32>
    %118 = arith.divf %116, %117 : vector<16x1xf32>
    %119 = vector.broadcast %109 : vector<16x1xf32> to vector<16x128xf32>
    %120 = arith.subf %105, %119 : vector<16x128xf32>
    %cst_39 = arith.constant 9.99999974E-6 : f32
    %121 = vector.broadcast %cst_39 : f32 to vector<16x1xf32>
    %122 = arith.addf %118, %121 : vector<16x1xf32>
    %123 = math.rsqrt %122 : vector<16x1xf32>
    %124 = vector.broadcast %123 : vector<16x1xf32> to vector<16x128xf32>
    %125 = arith.mulf %120, %124 : vector<16x128xf32>
    %c0_40 = arith.constant 0 : index
    %c0_41 = arith.constant 0 : index
    %126 = vector.load %arg8[%c0_40, %c0_41] : memref<1x128xf32, #tpu.memory_space<vmem>>, vector<1x128xf32>
    %127 = vector.broadcast %126 : vector<1x128xf32> to vector<16x128xf32>
    %128 = arith.mulf %125, %127 : vector<16x128xf32>
    %c0_42 = arith.constant 0 : index
    %c0_43 = arith.constant 0 : index
    %129 = vector.load %arg9[%c0_42, %c0_43] : memref<1x128xf32, #tpu.memory_space<vmem>>, vector<1x128xf32>
    %130 = vector.broadcast %129 : vector<1x128xf32> to vector<16x128xf32>
    %131 = arith.addf %128, %130 : vector<16x128xf32>
    %132 = arith.truncf %131 : vector<16x128xf32> to vector<16x128xbf16>
    %c0_44 = arith.constant 0 : index
    %c0_45 = arith.constant 0 : index
    %133 = vector.load %arg10[%c0_44, %c0_45] : memref<128x512xbf16, #tpu.memory_space<vmem>>, vector<128x512xbf16>
    %cst_46 = arith.constant dense<0.000000e+00> : vector<16x512xf32>
    %134 = tpu.matmul %132, %133, %cst_46 {dimension_numbers = #tpu.dot_dimension_numbers<[1], [0], [0], [1], [0, 0, 1, 1], [], []>} : vector<16x128xbf16>, vector<128x512xbf16>, vector<16x512xf32> -> vector<16x512xf32>
    %c0_47 = arith.constant 0 : index
    %c0_48 = arith.constant 0 : index
    %135 = vector.load %arg11[%c0_47, %c0_48] : memref<1x512xf32, #tpu.memory_space<vmem>>, vector<1x512xf32>
    %136 = vector.broadcast %135 : vector<1x512xf32> to vector<16x512xf32>
    %137 = arith.addf %134, %136 : vector<16x512xf32>
    %138 = arith.truncf %137 : vector<16x512xf32> to vector<16x512xbf16>
    %cst_49 = arith.constant 1.703130e+00 : bf16
    %139 = vector.broadcast %cst_49 : bf16 to vector<16x512xbf16>
    %140 = arith.mulf %139, %138 : vector<16x512xbf16>
    %141 = arith.negf %140 : vector<16x512xbf16>
    %142 = math.exp %141 : vector<16x512xbf16>
    %cst_50 = arith.constant 1.000000e+00 : bf16
    %143 = vector.broadcast %cst_50 : bf16 to vector<16x512xbf16>
    %144 = arith.addf %143, %142 : vector<16x512xbf16>
    %145 = arith.divf %143, %144 : vector<16x512xbf16>
    %146 = arith.mulf %138, %145 : vector<16x512xbf16>
    %c0_51 = arith.constant 0 : index
    %c0_52 = arith.constant 0 : index
    %147 = vector.load %arg12[%c0_51, %c0_52] : memref<512x128xbf16, #tpu.memory_space<vmem>>, vector<512x128xbf16>
    %cst_53 = arith.constant dense<0.000000e+00> : vector<16x128xf32>
    %148 = tpu.matmul %146, %147, %cst_53 {dimension_numbers = #tpu.dot_dimension_numbers<[1], [0], [0], [1], [0, 0, 1, 1], [], []>} : vector<16x512xbf16>, vector<512x128xbf16>, vector<16x128xf32> -> vector<16x128xf32>
    %c0_54 = arith.constant 0 : index
    %c0_55 = arith.constant 0 : index
    %149 = vector.load %arg13[%c0_54, %c0_55] : memref<1x128xf32, #tpu.memory_space<vmem>>, vector<1x128xf32>
    %150 = vector.broadcast %149 : vector<1x128xf32> to vector<16x128xf32>
    %151 = arith.addf %148, %150 : vector<16x128xf32>
    %152 = arith.addf %105, %151 : vector<16x128xf32>
    %c0_56 = arith.constant 0 : index
    %c0_57 = arith.constant 0 : index
    %153 = vector.load %arg14[%c0_56, %c0_57] : memref<16x128xf32, #tpu.memory_space<vmem>>, vector<16x128xf32>
    tpu.vector_store %arg14[%c0_56, %c0_57], %152 {strides = array<i32>} : memref<16x128xf32, #tpu.memory_space<vmem>>, vector<16x128xf32>,
    return
  }
  func.func @transform_0(%arg0: i32) -> (i32, i32) {
    %c0_i32 = arith.constant 0 : i32
    %c0_i32_0 = arith.constant 0 : i32
    return %c0_i32, %arg0 : i32, i32
  }
  func.func @transform_1(%arg0: i32) -> (i32, i32) {
    %c0_i32 = arith.constant 0 : i32
    %c0_i32_0 = arith.constant 0 : i32
    %c0_i32_1 = arith.constant 0 : i32
    return %c0_i32, %c0_i32_0 : i32, i32
  }
  func.func @transform_2(%arg0: i32) -> (i32, i32) {
    %c0_i32 = arith.constant 0 : i32
    %c0_i32_0 = arith.constant 0 : i32
    %c0_i32_1 = arith.constant 0 : i32
    return %c0_i32, %c0_i32_0 : i32, i32
  }
  func.func @transform_3(%arg0: i32) -> (i32, i32) {
    %c0_i32 = arith.constant 0 : i32
    %c0_i32_0 = arith.constant 0 : i32
    %c0_i32_1 = arith.constant 0 : i32
    return %c0_i32, %c0_i32_0 : i32, i32
  }
  func.func @transform_4(%arg0: i32) -> (i32, i32) {
    %c0_i32 = arith.constant 0 : i32
    %c0_i32_0 = arith.constant 0 : i32
    %c0_i32_1 = arith.constant 0 : i32
    return %c0_i32, %c0_i32_0 : i32, i32
  }
  func.func @transform_5(%arg0: i32) -> (i32, i32) {
    %c0_i32 = arith.constant 0 : i32
    %c0_i32_0 = arith.constant 0 : i32
    %c0_i32_1 = arith.constant 0 : i32
    return %c0_i32, %c0_i32_0 : i32, i32
  }
  func.func @transform_6(%arg0: i32) -> (i32, i32) {
    %c0_i32 = arith.constant 0 : i32
    %c0_i32_0 = arith.constant 0 : i32
    %c0_i32_1 = arith.constant 0 : i32
    return %c0_i32, %c0_i32_0 : i32, i32
  }
  func.func @transform_7(%arg0: i32) -> (i32, i32) {
    %c0_i32 = arith.constant 0 : i32
    %c0_i32_0 = arith.constant 0 : i32
    %c0_i32_1 = arith.constant 0 : i32
    return %c0_i32, %c0_i32_0 : i32, i32
  }
  func.func @transform_8(%arg0: i32) -> (i32, i32) {
    %c0_i32 = arith.constant 0 : i32
    %c0_i32_0 = arith.constant 0 : i32
    %c0_i32_1 = arith.constant 0 : i32
    return %c0_i32, %c0_i32_0 : i32, i32
  }
  func.func @transform_9(%arg0: i32) -> (i32, i32) {
    %c0_i32 = arith.constant 0 : i32
    %c0_i32_0 = arith.constant 0 : i32
    %c0_i32_1 = arith.constant 0 : i32
    return %c0_i32, %c0_i32_0 : i32, i32
  }
  func.func @transform_10(%arg0: i32) -> (i32, i32) {
    %c0_i32 = arith.constant 0 : i32
    %c0_i32_0 = arith.constant 0 : i32
    %c0_i32_1 = arith.constant 0 : i32
    return %c0_i32, %c0_i32_0 : i32, i32
  }
  func.func @transform_11(%arg0: i32) -> (i32, i32) {
    %c0_i32 = arith.constant 0 : i32
    %c0_i32_0 = arith.constant 0 : i32
    %c0_i32_1 = arith.constant 0 : i32
    return %c0_i32, %c0_i32_0 : i32, i32
  }
  func.func @transform_12(%arg0: i32) -> (i32, i32) {
    %c0_i32 = arith.constant 0 : i32
    %c0_i32_0 = arith.constant 0 : i32
    %c0_i32_1 = arith.constant 0 : i32
    return %c0_i32, %c0_i32_0 : i32, i32
  }
  func.func @transform_13(%arg0: i32) -> (i32, i32) {
    %c0_i32 = arith.constant 0 : i32
    %c0_i32_0 = arith.constant 0 : i32
    return %c0_i32, %arg0 : i32, i32
  }
}

</mosaic_0001>

<bundles_post_ra>
// kernel: mul.9
= control target key start
LH: loop header
LB: loop body
LE: loop exit
PB: predicated region body
PF: predicated region fallthrough
CT: control target
= control target key end

     0   :  { %s34_s0 = inlined_call_operand.vmem [shape: f32[384], index: 0, kind: input, shape index: {}]   ;;  %s35_s1 = inlined_call_operand.vmem [shape: f32[384], index: 1, kind: input, shape index: {}]   ;;  %s36_s2 = inlined_call_operand.vmem [shape: f32[384], index: 2, kind: output, shape index: {}]  }
   0x1   :  { %v3_v0 = vld [vmem:[%s34_s0] sm:$0x7] }
   0x2   :  { %v4_v1 = vld [vmem:[%s35_s1] sm:$0x7] }
   0x3   :  { %v7_v2 = vmul.f32 %v4_v1, %v3_v0 }
   0x5   :  { %9 = vst [vmem:[%s36_s2] sm:$0xf] %v7_v2 }

// kernel: residual_attention_block.1
= control target key start
LH: loop header
LB: loop body
LE: loop exit
PB: predicated region body
PF: predicated region fallthrough
CT: control target
= control target key end

     0   :  { %s2860_s25 = smov 0   ;;  %s2862_s26 = smov 0   ;;  %s3391_s0 = inlined_call_operand.vmem [shape: f32[16,512], index: 0, kind: input, shape index: {}]   ;;  %s3392_s1 = inlined_call_operand.vmem [shape: f32[1,128], index: 1, kind: input, shape index: {}]   ;;  %s3393_s2 = inlined_call_operand.vmem [shape: f32[1,128], index: 2, kind: input, shape index: {}]   ;;  %s3394_s3 = inlined_call_operand.vmem [shape: bf16[128,384], index: 3, kind: input, shape index: {}]   ;;  %s3395_s4 = inlined_call_operand.vmem [shape: f32[1,384], index: 4, kind: input, shape index: {}]   ;;  %s3396_s5 = inlined_call_operand.vmem [shape: bf16[128,128], index: 5, kind: input, shape index: {}]   ;;  %s3397_s6 = inlined_call_operand.vmem [shape: f32[1,128], index: 6, kind: input, shape index: {}]   ;;  %s3398_s7 = inlined_call_operand.vmem [shape: f32[1,128], index: 7, kind: input, shape index: {}]   ;;  %s3399_s8 = inlined_call_operand.vmem [shape: f32[1,128], index: 8, kind: input, shape index: {}]   ;;  %s3400_s9 = inlined_call_operand.vmem [shape: bf16[128,512], index: 9, kind: input, shape index: {}]   ;;  %s3401_s10 = inlined_call_operand.vmem [shape: f32[1,512], index: 10, kind: input, shape index: {}]   ;;  %s3402_s11 = inlined_call_operand.vmem [shape: bf16[512,128], index: 11, kind: input, shape index: {}]   ;;  %s3403_s12 = inlined_call_operand.vmem [shape: f32[1,128], index: 12, kind: input, shape index: {}]   ;;  %s3404_s13 = inlined_call_operand.vmem [shape: f32[16,512], index: 13, kind: output, shape index: {}]  }
   0x1   :  { %s2864_s27 = smov 0  }
   0x2 LB: > { %s3405_s28 = sadd.s32 4294967295, %s2782_s27   ;;  %s2877_s29 = sadd.s32 1, %s2782_s27   ;;  %s2782_s27 = sphi %s2864_s27, %s3410_s27   ;;  %s2778_s26 = sphi %s2862_s26, %s3409_s26   ;;  %s2774_s25 = sphi %s2860_s25, %s3408_s25  }
   0x3   : > { %s27_s30 = ssub.s32 %s2782_s27, %s2877_s29  ;;  %s30_s14 = sadd.s32 1, %s2778_s26 }
   0x4   : > { %p28_p0 = scmp.eq.s32.totalorder %s27_s30, 0  ;;  %p37_p1 = scmp.ne.s32.totalorder %s2778_s26, %s2774_s25 }
   0x5   : > { %p38_p2 = scmp.eq.s32.totalorder %s2782_s27, 0  ;;  %p319_p3 = scmp.eq.s32.totalorder %s3405_s28, 3 }
   0x6   : > { %s2888_s15 = scalar_select %p28_p0, %s2778_s26, %s30_s14  }
   0x7   : > { %p39_p4 = por %p38_p2, %p37_p1  ;;  %p2890_p5 = por %p319_p3, %p37_p1 }
   0x8   : > { %p2247_p6 = scmp.ge.s32.totalorder %s2782_s27, 4 }
   0xa   : > { %377 = sbr.rel (%p2247_p6) target bundleno = 24 (0x18), region = 64 }
  0x11   : > { %380 = sbr.rel (!%p39_p4) target bundleno = 24 (0x18), region = 68  ;;  %s382_s17 = sand.u32 (%p39_p4), 1, %s2778_s26  }
  0x12   : > { %s2249_s18 = sshll.u32 (%p39_p4), %s2782_s27, 3  ;;  %s2248_s19 = sshll.u32 (%p39_p4), %s382_s17, 4 }
  0x13   : > { %s386_s22 = scalar_lea.vmem (%p39_p4), %s3391_s0, %s2249_s18  ;;  %s384_s23 = scalar_lea.vmem (%p39_p4), [#allocation2], %s2248_s19 }
  0x14   : > { %v416_v0 = vld [vmem:[%s386_s22] sm:$0xff] (%p39_p4) }
  0x15   : > { %v418_v1 = vld [vmem:[%s386_s22 + $0x20] sm:$0xff] (%p39_p4)  ;;  %417 = vst [vmem:[%s384_s23] sm:$0xff] (%p39_p4), %v416_v0 }
  0x16   : > { %419 = vst [vmem:[%s384_s23 + $0x8] sm:$0xff] (%p39_p4), %v418_v1 }
  0x18 PF: > { %p2250_p7 = scmp.ge.s32.totalorder %s2782_s27, 1  ;;  %p424_p8 = scmp.lt.s32.totalorder %s2782_s27, 5 }
  0x1a   : > { %p425_p9 = pnand %p2250_p7, %p424_p8 }
  0x1b   : > { %s431_s24 = sand.u32 (!%p425_p9), 1, %s2774_s25   ;;  %v2582_v4 = vld [vmem:[%s3394_s3 + $0x4] ss:$12 sps:$4 sm:$0xff] (!%p425_p9)   ;;  %v2584_v5 = vld [vmem:[%s3394_s3] ss:$12 sps:$4 sm:$0xff] (!%p425_p9)   ;;  %v2784_v6 = vmov (!%p425_p9), 0.0   ;;  %v554_v55 = vlaneseq (!%p425_p9) }
  0x1c   : > { %428 = sbr.rel (%p425_p9) target bundleno = 3030 (0xbd6), region = 106  ;;  %s2903_s30 = sshll.u32 (!%p425_p9), %s431_s24, 4  ;;  %2449 = vmatprep.subr.bf16.mxu1 (!%p425_p9), %v2784_v6  ;;  %v2585_v7 = vld [vmem:[%s3394_s3 + $0x8] ss:$12 sps:$4 sm:$0xff] (!%p425_p9)   ;;  %697 = vmatprep.subr.bf16.mxu0 (!%p425_p9), %v2582_v4  ;;  %v2588_v17 = vld [vmem:[%s3394_s3 + $0x18] ss:$12 sps:$4 sm:$0xff] (!%p425_p9)  }
  0x1d   : > { %s2906_s14 = scalar_lea.vmem (!%p425_p9), [#allocation2], %s2903_s30  ;;  %v2586_v8 = vld [vmem:[%s3394_s3 + $0x1c] ss:$12 sps:$4 sm:$0xff] (!%p425_p9)   ;;  %698 = vmatpush1.bf16.msra.mxu0 (!%p425_p9), %v2584_v5  ;;  %2450 = vmatpush3.bf16.msra.mxu1 (!%p425_p9), %v2585_v7  ;;  %v2589_v18 = vld [vmem:[%s3394_s3 + $0x20] ss:$12 sps:$4 sm:$0xff] (!%p425_p9)   ;;  %v2785_v32 = vmov (!%p425_p9), 0  }
  0x1e   : > { %v476_v2 = vld [vmem:[%s2906_s14] sm:$0xff] (!%p425_p9)  ;;  %v477_v3 = vld [vmem:[%s2906_s14 + $0x8] sm:$0xff] (!%p425_p9)  ;;  %699 = vmatprep.subr.bf16.mxu0 (!%p425_p9), %v2586_v8  ;;  %2451 = vmatprep.subr.bf16.mxu1 (!%p425_p9), %v2784_v6  ;;  %vm2786_vm0 = vmmov (!%p425_p9), 0   ;;  %v3015_v56 = vshrl.u32 (!%p425_p9), %v554_v55, 7  ;;  %vm784_vm1 = vcmask (!%p425_p9), 261120   ;;  %vm832_vm2 = vcmask (!%p425_p9), 130048  }
  0x1f   : > { %478 = vadd.xlane.f32.xlu0 (!%p425_p9), %v476_v2  ;;  %v2590_v19 = vld [vmem:[%s3394_s3 + $0x34] ss:$12 sps:$4 sm:$0xff] (!%p425_p9)   ;;  %v2592_v20 = vld [vmem:[%s3394_s3 + $0x30] ss:$12 sps:$4 sm:$0xff] (!%p425_p9)   ;;  %v2593_v21 = vld [vmem:[%s3394_s3 + $0x38] ss:$12 sps:$4 sm:$0xff] (!%p425_p9)   ;;  %729 = vmatprep.mubr.bf16.mxu0 (!%p425_p9), %v2785_v32 }
  0x20   : > { %v2594_v22 = vld [vmem:[%s3394_s3 + $0x4c] ss:$12 sps:$4 sm:$0xff] (!%p425_p9)   ;;  %v2596_v23 = vld [vmem:[%s3394_s3 + $0x48] ss:$12 sps:$4 sm:$0xff] (!%p425_p9)   ;;  %v2597_v24 = vld [vmem:[%s3394_s3 + $0x50] ss:$12 sps:$4 sm:$0xff] (!%p425_p9)   ;;  %2465 = vmatprep.mubr.msk.bf16.mxu1 (!%p425_p9), %vm2786_vm0, %v2784_v6 }
  0x21   : > { %700 = vmatpush1.bf16.msra.mxu0 (!%p425_p9), %v2588_v17  ;;  %2452 = vmatpush3.bf16.msra.mxu1 (!%p425_p9), %v2589_v18  ;;  %v2598_v25 = vld [vmem:[%s3394_s3 + $0x64] ss:$12 sps:$4 sm:$0xff] (!%p425_p9)   ;;  %v2600_v26 = vld [vmem:[%s3394_s3 + $0x60] ss:$12 sps:$4 sm:$0xff] (!%p425_p9)   ;;  %v2601_v27 = vld [vmem:[%s3394_s3 + $0x68] ss:$12 sps:$4 sm:$0xff] (!%p425_p9)  }
  0x22   : > { %2453 = vmatprep.subr.bf16.mxu1 (!%p425_p9), %v2784_v6  ;;  %701 = vmatprep.subr.bf16.mxu0 (!%p425_p9), %v2590_v19  ;;  %v2602_v28 = vld [vmem:[%s3394_s3 + $0x7c] ss:$12 sps:$4 sm:$0xff] (!%p425_p9)   ;;  %v2604_v29 = vld [vmem:[%s3394_s3 + $0x78] ss:$12 sps:$4 sm:$0xff] (!%p425_p9)   ;;  %v2605_v30 = vld [vmem:[%s3394_s3 + $0x80] ss:$12 sps:$4 sm:$0xff] (!%p425_p9)  }
  0x23   : > { %480 = vadd.xlane.f32.xlu0 %v477_v3  ;;  %v2606_v31 = vld [vmem:[%s3394_s3 + $0x94] ss:$12 sps:$4 sm:$0xff]   ;;  %v2608_v33 = vld [vmem:[%s3394_s3 + $0x90] ss:$12 sps:$4 sm:$0xff]   ;;  %v2609_v34 = vld [vmem:[%s3394_s3 + $0x98] ss:$12 sps:$4 sm:$0xff]  }
  0x24   : > { %v2610_v35 = vld [vmem:[%s3394_s3 + $0xac] ss:$12 sps:$4 sm:$0xff]   ;;  %v2612_v36 = vld [vmem:[%s3394_s3 + $0xa8] ss:$12 sps:$4 sm:$0xff]   ;;  %v2613_v37 = vld [vmem:[%s3394_s3 + $0xb0] ss:$12 sps:$4 sm:$0xff]  }
  0x25   : > { %702 = vmatpush1.bf16.msra.mxu0 %v2592_v20  ;;  %2454 = vmatpush3.bf16.msra.mxu1 %v2593_v21  ;;  %v2253_v46 = vld [vmem:[%s3392_s1] ss:$0 sm:$0xff]  ;;  %v556_v57 = vsub.s32 0, %v3015_v56  ;;  %v564_v58 = vsub.s32 2, %v3015_v56  ;;  %v560_v60 = vsub.s32 1, %v3015_v56  ;;  %s2787_s28 = smov 96  }
  0x26   : > { %2455 = vmatprep.subr.bf16.mxu1 %v2784_v6  ;;  %703 = vmatprep.subr.bf16.mxu0 %v2594_v22  ;;  %v2254_v50 = vld [vmem:[%s3393_s2] ss:$0 sm:$0xff]  ;;  %s2788_s21 = smov 64   ;;  %s2789_s22 = smov 32   ;;  %vm1292_vm3 = vcmask 523264   ;;  %vm1295_vm4 = vcmask 785408  }
  0x27   : > { %v552_v59 = vld [vmem:[%s3395_s4] sm:$0x7]  ;;  %s472_s20 = scalar_lea.vmem [#allocation3], %s2903_s30  ;;  %s3407_s25 = sadd.s32 (%p2890_p5), 4294967295, %s2782_s27  }
  0x28   : > { %v557_v61 = vrot.slane %v552_v59, %v556_v57  ;;  %v565_v62 = vrot.slane %v552_v59, %v564_v58  ;;  %v561_v1 = vrot.slane %v552_v59, %v560_v60  ;;  %s2368_s23 = sshll.u32 (%p2890_p5), %s3407_s25, 3 }
  0x29   : > { %704 = vmatpush1.bf16.msra.mxu0 %v2596_v23  ;;  %2456 = vmatpush3.bf16.msra.mxu1 %v2597_v24 }
  0x2a   : > { %2457 = vmatprep.subr.bf16.mxu1 %v2784_v6  ;;  %705 = vmatprep.subr.bf16.mxu0 %v2598_v25 }
  0x2d   : > { %706 = vmatpush1.bf16.msra.mxu0 %v2600_v26  ;;  %2458 = vmatpush3.bf16.msra.mxu1 %v2601_v27 }
  0x2e   : > { %707 = vmatprep.subr.bf16.mxu0 %v2602_v28  ;;  %2459 = vmatprep.subr.bf16.mxu1 %v2784_v6 }
  0x31   : > { %708 = vmatpush1.bf16.msra.mxu0 %v2604_v29  ;;  %2460 = vmatpush3.bf16.msra.mxu1 %v2605_v30 }
  0x32   : > { %709 = vmatprep.subr.bf16.mxu0 %v2606_v31  ;;  %2461 = vmatprep.subr.bf16.mxu1 %v2784_v6 }
  0x35   : > { %710 = vmatpush1.bf16.msra.mxu0 %v2608_v33  ;;  %2462 = vmatpush3.bf16.msra.mxu1 %v2609_v34 }
  0x36   : > { %711 = vmatprep.subr.bf16.mxu0 %v2610_v35  ;;  %2463 = vmatprep.subr.bf16.mxu1 %v2784_v6 }
  0x39   : > { %712 = vmatpush1.bf16.msra.mxu0 %v2612_v36  ;;  %2464 = vmatpush3.bf16.msra.mxu1 %v2613_v37 }
  0x3a   : > { %2469 = vmatprep.subr.bf16.mxu1 %v2784_v6  ;;  %2493 = vmatprep.subr.bf16.mxu0 %v2784_v6 }
  0xac   : > { %v479_v9 = vpop.xlane.xlu0 %478 }
  0xad   : > { %v483_v10 = vmul.f32 0.0078125, %v479_v9 }
  0xaf   : > { %v2924_v11 = vsub.f32 %v476_v2, %v483_v10 }
  0xb0   : > { %v481_v12 = vpop.xlane.xlu0 %480 }
  0xb1   : > { %v484_v13 = vmul.f32 0.0078125, %v481_v12  ;;  %v487_v14 = vmul.f32 %v2924_v11, %v2924_v11 }
  0xb3   : > { %v2928_v15 = vsub.f32 %v477_v3, %v484_v13  ;;  %489 = vadd.xlane.f32.xlu1 %v487_v14 }
  0xb5   : > { %v488_v16 = vmul.f32 %v2928_v15, %v2928_v15 }
  0xb7   : > { %491 = vadd.xlane.f32.xlu1 %v488_v16 }
 0x140   : > { %v490_v38 = vpop.xlane.xlu1 %489 }
 0x141   : > { %v493_v39 = vmul.f32 0.0078125, %v490_v38 }
 0x143   : > { %v495_v40 = vadd.f32 1e-05, %v493_v39 }
 0x144   : > { %v492_v41 = vpop.xlane.xlu1 %491 }
 0x145   : > { %2702 = vrsqrt.f32 %v495_v40  ;;  %v494_v42 = vmul.f32 0.0078125, %v492_v41 }
 0x147   : > { %v496_v43 = vadd.f32 1e-05, %v494_v42 }
 0x149   : > { %2704 = vrsqrt.f32 %v496_v43 }
 0x14f   : > { %v2703_v44 = vpop.eup %2702 }
 0x150   : > { %v499_v45 = vmul.f32 %v2703_v44, %v2924_v11 }
 0x152   : > { %v508_v49 = vmul.f32 %v2253_v46, %v499_v45 }
 0x153   : > { %v2705_v47 = vpop.eup %2704 }
 0x154   : > { %v500_v48 = vmul.f32 %v2705_v47, %v2928_v15  ;;  %v517_v52 = vadd.f32 %v2254_v50, %v508_v49 }
 0x156   : > { %v509_v51 = vmul.f32 %v2253_v46, %v500_v48 }
 0x158   : > { %v518_v53 = vadd.f32 %v2254_v50, %v509_v51 }
 0x15a   : > { %v519_v54 = vpack.c.bf16 %v518_v53, %v517_v52 }
 0x15c   : > { %730 = vmatmul.mubr.bf16.vlgmr.msra.gmra.mrb[0].mxu0 %v519_v54  ;;  %2466 = vmatmul.mubr.bf16.vlgmr.msra.gmra.mrb[0].mxu1 %v519_v54 }
 0x15d   : > { %2471 = vmatprep.mubr.msk.bf16.mxu1 %vm2786_vm0, %v2784_v6  ;;  %2495 = vmatprep.mubr.msk.bf16.mxu0 %vm2786_vm0, %v2784_v6 }
 0x22f   : > { %v731_v63 = vpop.f32.mrb[0].mxu0  ;;  %v774_v0 = vpop.f32.mrb[0].mxu1 }
 0x230   : > { %v733_v2 = vpop.f32.mrb[1].mxu0  ;;  %v2467_v3 = vpop.f32.mrb[1].mxu1  ;;  %v732_v7 = vadd.f32 %v731_v63, %v557_v61  ;;  %v775_v8 = vadd.f32 %v774_v0, %v565_v62 }
 0x231   : > { %v735_v4 = vpop.f32.mrb[2].mxu0  ;;  %v777_v5 = vpop.f32.mrb[2].mxu1  ;;  %v734_v13 = vadd.f32 %v733_v2, %v561_v1 }
 0x232   : > { %v736_v9 = vadd.f32 %v735_v4, %v557_v61  ;;  %v778_v10 = vadd.f32 %v777_v5, %v565_v62  ;;  %v737_v11 = vpop.f32.mrb[3].mxu0  ;;  %v2468_v12 = vpop.f32.mrb[3].mxu1 }
 0x233   : > { %v738_v14 = vadd.f32 %v737_v11, %v561_v1 }
 0x234   : > { %v781_v15 = vpack.c.bf16 %v736_v9, %v732_v7  ;;  %v3029_v16 = vpack.c.bf16 %v778_v10, %v775_v8 }
 0x235   : > { %v782_v17 = vpack.c.bf16 %v738_v14, %v734_v13 }
 0x237   : > { %v789_v18 = vsel %vm784_vm1, %v782_v17, 0 }
 0x238   : > { %2470 = vmatpush3.bf16.xpose.msra.mxu1 %v789_v18 }
 0x239   : > { %2475 = vmatprep.subr.bf16.mxu1 %v2784_v6 }
 0x23f   : > { %2472 = vmatmul.mubr.msk.bf16.vlgmr.msra.gmra.mrb[4].mxu1 %vm784_vm1, %v781_v15 }
 0x240   : > { %2476 = vmatpush3.bf16.msra.mxu1 %v3029_v16  ;;  %2477 = vmatprep.mubr.msk.bf16.mxu1 %vm2786_vm0, %v2784_v6 }
 0x241   : > { %2481 = vmatprep.subr.bf16.mxu1 %v2784_v6 }
 0x312   : > { %v825_v19 = vpop.f32.mrb[4].mxu1 }
 0x313   : > { %v2473_v20 = vpop.f32.mrb[5].mxu1  ;;  %v833_v21 = vsel %vm832_vm2, %v825_v19, -inf }
 0x314   : > { %834 = vmax.xlane.f32.xlu0 %v833_v21  ;;  %v828_v22 = vpop.f32.mrb[6].mxu1 }
 0x315   : > { %v2474_v23 = vpop.f32.mrb[7].mxu1  ;;  %v836_v24 = vsel %vm832_vm2, %v828_v22, -inf }
 0x316   : > { %837 = vmax.xlane.f32.xlu1 %v836_v24 }
 0x3a1   : > { %v835_v25 = vpop.xlane.xlu0 %834 }
 0x3a2   : > { %v839_v26 = vsub.f32 %v825_v19, %v835_v25 }
 0x3a3   : > { %v838_v27 = vpop.xlane.xlu1 %837 }
 0x3a4   : > { %v841_v28 = vmul.f32 1.442695, %v839_v26  ;;  %v840_v29 = vsub.f32 %v828_v22, %v838_v27 }
 0x3a6   : > { %2706 = vpow2.f32 %v841_v28  ;;  %v843_v30 = vmul.f32 1.442695, %v840_v29 }
 0x3a8   : > { %2708 = vpow2.f32 %v843_v30 }
 0x3b0   : > { %v2707_v31 = vpop.eup %2706 }
 0x3b1   : > { %v845_v33 = vsel %vm832_vm2, %v2707_v31, 0.0 }
 0x3b2   : > { %v2709_v34 = vpop.eup %2708  ;;  %846 = vadd.xlane.f32.xlu0 %v845_v33 }
 0x3b3   : > { %v848_v35 = vsel %vm832_vm2, %v2709_v34, 0.0 }
 0x3b4   : > { %849 = vadd.xlane.f32.xlu1 %v848_v35 }
 0x3c5   : > { %901 = vrot.lane.b32.xlu1 %v781_v15, %s2787_s28 }
 0x3c8   : > { %904 = vrot.lane.b32.xlu0 %v782_v17, %s2787_s28 }
 0x3c9   : > { %1026 = vrot.lane.b32.xlu1 %v782_v17, %s2788_s21 }
 0x3cc   : > { %1147 = vrot.lane.b32.xlu0 %v782_v17, %s2789_s22 }
 0x3cd   : > { %1024 = vrot.lane.b32.xlu1 %v781_v15, %s2788_s21 }
 0x3d1   : > { %1145 = vrot.lane.b32.xlu1 %v781_v15, %s2789_s22 }
 0x43f   : > { %v847_v36 = vpop.xlane.xlu0 %846 }
 0x440   : > { %2710 = vrcp.f32 %v847_v36 }
 0x441   : > { %v850_v37 = vpop.xlane.xlu1 %849 }
 0x442   : > { %2712 = vrcp.f32 %v850_v37 }
 0x443   : > { %v905_v39 = vpop.permute.xlu0 %904 }
 0x444   : > { %v910_v48 = vsel %vm784_vm1, %v905_v39, 0 }
 0x445   : > { %v902_v38 = vpop.permute.xlu1 %901 }
 0x447   : > { %v1148_v46 = vpop.permute.xlu0 %1147 }
 0x448   : > { %v1153_v50 = vsel %vm784_vm1, %v1148_v46, 0 }
 0x449   : > { %v1027_v40 = vpop.permute.xlu1 %1026 }
 0x44a   : > { %v2711_v41 = vpop.eup %2710  ;;  %v1032_v42 = vsel %vm784_vm1, %v1027_v40, 0 }
 0x44b   : > { %2494 = vmatpush3.bf16.xpose.msra.mxu0 %v1032_v42  ;;  %v853_v44 = vmul.f32 %v2711_v41, %v2707_v31 }
 0x44c   : > { %v2713_v43 = vpop.eup %2712  ;;  %2505 = vmatprep.subr.bf16.mxu0 %v2784_v6 }
 0x44d   : > { %v854_v45 = vmul.f32 %v2713_v43, %v2709_v34  ;;  %v1025_v49 = vpop.permute.xlu1 %1024 }
 0x44f   : > { %v855_v47 = vpack.c.bf16 %v854_v45, %v853_v44 }
 0x451   : > { %2478 = vmatmul.mubr.msk.bf16.vlgmr.msra.gmra.mrb[8].mxu1 %vm832_vm2, %v855_v47  ;;  %v1146_v51 = vpop.permute.xlu1 %1145 }
 0x452   : > { %2482 = vmatpush3.bf16.xpose.msra.mxu1 %v910_v48  ;;  %2496 = vmatmul.mubr.msk.bf16.vlgmr.msra.gmra.mrb[4].mxu0 %vm784_vm1, %v1025_v49 }
 0x453   : > { %2506 = vmatpush3.bf16.xpose.msra.mxu0 %v1153_v50  ;;  %2483 = vmatprep.mubr.msk.bf16.mxu1 %vm2786_vm0, %v2784_v6 }
 0x454   : > { %2507 = vmatprep.mubr.msk.bf16.mxu0 %vm2786_vm0, %v2784_v6  ;;  %2487 = vmatprep.subr.bf16.mxu1 %v2784_v6 }
 0x455   : > { %2517 = vmatprep.subr.bf16.mxu0 %v2784_v6 }
 0x459   : > { %2484 = vmatmul.mubr.msk.bf16.vlgmr.msra.gmra.mrb[12].mxu1 %vm784_vm1, %v902_v38 }
 0x45a   : > { %2508 = vmatmul.mubr.msk.bf16.vlgmr.msra.gmra.mrb[8].mxu0 %vm784_vm1, %v1146_v51  ;;  %2489 = vmatprep.mubr.msk.bf16.mxu1 %vm2786_vm0, %v2784_v6 }
 0x45b   : > { %2533 = vmatprep.mubr.msk.bf16.mxu0 %vm2786_vm0, %v2784_v6 }
 0x524   : > { %v3066_v52 = vpop.f32.mrb[8].mxu1 }
 0x525   : > { %v2479_v53 = vpop.f32.mrb[9].mxu1  ;;  %v1068_v54 = vpop.f32.mrb[4].mxu0 }
 0x526   : > { %v3068_v55 = vpop.f32.mrb[10].mxu1  ;;  %v2497_v59 = vpop.f32.mrb[5].mxu0  ;;  %v1075_v11 = vsel %vm832_vm2, %v1068_v54, -inf }
 0x527   : > { %v2480_v61 = vpop.f32.mrb[11].mxu1  ;;  %v1071_v62 = vpop.f32.mrb[6].mxu0 }
 0x528   : > { %v2498_v63 = vpop.f32.mrb[7].mxu0  ;;  %v1078_v13 = vsel %vm832_vm2, %v1071_v62, -inf }
 0x52c   : > { %v946_v0 = vpop.f32.mrb[12].mxu1 }
 0x52d   : > { %v2485_v1 = vpop.f32.mrb[13].mxu1  ;;  %v1189_v2 = vpop.f32.mrb[8].mxu0  ;;  %v953_v3 = vsel %vm832_vm2, %v946_v0, -inf }
 0x52e   : > { %v2509_v4 = vpop.f32.mrb[9].mxu0  ;;  %954 = vmax.xlane.f32.xlu0 %v953_v3  ;;  %v949_v5 = vpop.f32.mrb[14].mxu1  ;;  %v1196_v14 = vsel %vm832_vm2, %v1189_v2, -inf }
 0x52f   : > { %v2486_v7 = vpop.f32.mrb[15].mxu1  ;;  %v1192_v8 = vpop.f32.mrb[10].mxu0  ;;  %v956_v9 = vsel %vm832_vm2, %v949_v5, -inf }
 0x530   : > { %v2510_v10 = vpop.f32.mrb[11].mxu0  ;;  %957 = vmax.xlane.f32.xlu1 %v956_v9  ;;  %v1199_v12 = vsel %vm832_vm2, %v1192_v8, -inf }
 0x532   : > { %1076 = vmax.xlane.f32.xlu0 %v1075_v11 }
 0x534   : > { %1200 = vmax.xlane.f32.xlu1 %v1199_v12 }
 0x536   : > { %1079 = vmax.xlane.f32.xlu0 %v1078_v13  ;;  %v2614_v13 = vld [vmem:[%s3396_s5] sm:$0xff]  }
 0x537   : > { %2518 = vmatpush3.bf16.msra.mxu0 %v2614_v13 }
 0x538   : > { %2519 = vmatprep.subr.bf16.mxu0 %v2784_v6 }
 0x53a   : > { %1197 = vmax.xlane.f32.xlu0 %v1196_v14  ;;  %v2615_v14 = vld [vmem:[%s3396_s5 + $0x8] sm:$0xff]  }
 0x53b   : > { %2520 = vmatpush3.bf16.msra.mxu0 %v2615_v14 }
 0x53c   : > { %2521 = vmatprep.subr.bf16.mxu0 %v2784_v6 }
 0x5bb   : > { %v955_v15 = vpop.xlane.xlu0 %954 }
 0x5bc   : > { %v959_v25 = vsub.f32 %v946_v0, %v955_v15  ;;  %v2616_v15 = vld [vmem:[%s3396_s5 + $0x10] sm:$0xff]  }
 0x5bd   : > { %v958_v17 = vpop.xlane.xlu1 %957  ;;  %2522 = vmatpush3.bf16.msra.mxu0 %v2616_v15 }
 0x5be   : > { %v960_v26 = vsub.f32 %v949_v5, %v958_v17  ;;  %v961_v31 = vmul.f32 1.442695, %v959_v25  ;;  %2523 = vmatprep.subr.bf16.mxu0 %v2784_v6  ;;  %v2617_v17 = vld [vmem:[%s3396_s5 + $0x18] sm:$0xff]   ;;  %v2620_v25 = vld [vmem:[%s3396_s5 + $0x30] sm:$0xff]  }
 0x5bf   : > { %v1077_v18 = vpop.xlane.xlu0 %1076 }
 0x5c0   : > { %v1081_v19 = vsub.f32 %v1068_v54, %v1077_v18  ;;  %v963_v33 = vmul.f32 1.442695, %v960_v26  ;;  %v2618_v18 = vld [vmem:[%s3396_s5 + $0x20] sm:$0xff]  }
 0x5c1   : > { %v1201_v20 = vpop.xlane.xlu1 %1200  ;;  %2524 = vmatpush3.bf16.msra.mxu0 %v2617_v17 }
 0x5c2   : > { %v1083_v21 = vmul.f32 1.442695, %v1081_v19  ;;  %v1203_v22 = vsub.f32 %v1192_v8, %v1201_v20  ;;  %2525 = vmatprep.subr.bf16.mxu0 %v2784_v6 }
 0x5c3   : > { %v1080_v23 = vpop.xlane.xlu0 %1079 }
 0x5c4   : > { %2714 = vpow2.f32 %v1083_v21  ;;  %v1082_v24 = vsub.f32 %v1071_v62, %v1080_v23  ;;  %v1206_v27 = vmul.f32 1.442695, %v1203_v22  ;;  %v2619_v21 = vld [vmem:[%s3396_s5 + $0x28] sm:$0xff]  }
 0x5c5   : > { %2526 = vmatpush3.bf16.msra.mxu0 %v2618_v18 }
 0x5c6   : > { %v1085_v28 = vmul.f32 1.442695, %v1082_v24  ;;  %2527 = vmatprep.subr.bf16.mxu0 %v2784_v6 }
 0x5c7   : > { %v1198_v29 = vpop.xlane.xlu0 %1197 }
 0x5c8   : > { %2716 = vpow2.f32 %v1085_v28  ;;  %v1202_v30 = vsub.f32 %v1189_v2, %v1198_v29  ;;  %v2621_v28 = vld [vmem:[%s3396_s5 + $0x38] sm:$0xff]  }
 0x5c9   : > { %2718 = vpow2.f32 %v1206_v27  ;;  %2528 = vmatpush3.bf16.msra.mxu0 %v2619_v21  ;;  %v2639_v21 = vld [vmem:[%s3400_s9 + $0x4c] ss:$16 sps:$4 sm:$0xff]  }
 0x5ca   : > { %v1204_v34 = vmul.f32 1.442695, %v1202_v30  ;;  %2529 = vmatprep.subr.bf16.mxu0 %v2784_v6 }
 0x5cc   : > { %2720 = vpow2.f32 %v1204_v34 }
 0x5cd   : > { %2722 = vpow2.f32 %v961_v31  ;;  %2530 = vmatpush3.bf16.msra.mxu0 %v2620_v25  ;;  %v2645_v25 = vld [vmem:[%s3400_s9 + $0x6c] ss:$16 sps:$4 sm:$0xff]  }
 0x5ce   : > { %v2715_v35 = vpop.eup %2714  ;;  %2724 = vpow2.f32 %v963_v33  ;;  %2531 = vmatprep.subr.bf16.mxu0 %v2784_v6 }
 0x5cf   : > { %v1087_v36 = vsel %vm832_vm2, %v2715_v35, 0.0 }
 0x5d0   : > { %1088 = vadd.xlane.f32.xlu0 %v1087_v36 }
 0x5d1   : > { %2532 = vmatpush3.bf16.msra.mxu0 %v2621_v28  ;;  %v2648_v28 = vld [vmem:[%s3400_s9 + $0x84] ss:$16 sps:$4 sm:$0xff]  }
 0x5d2   : > { %v2717_v37 = vpop.eup %2716 }
 0x5d3   : > { %v1090_v38 = vsel %vm832_vm2, %v2717_v37, 0.0  ;;  %v2719_v39 = vpop.eup %2718 }
 0x5d4   : > { %1091 = vadd.xlane.f32.xlu1 %v1090_v38  ;;  %v1211_v43 = vsel %vm832_vm2, %v2719_v39, 0.0 }
 0x5d6   : > { %v2721_v40 = vpop.eup %2720 }
 0x5d7   : > { %v2723_v41 = vpop.eup %2722  ;;  %v1208_v42 = vsel %vm832_vm2, %v2721_v40, 0.0 }
 0x5d8   : > { %v2725_v44 = vpop.eup %2724  ;;  %1209 = vadd.xlane.f32.xlu0 %v1208_v42  ;;  %1212 = vadd.xlane.f32.xlu1 %v1211_v43  ;;  %v965_v45 = vsel %vm832_vm2, %v2723_v41, 0.0 }
 0x5d9   : > { %v968_v46 = vsel %vm832_vm2, %v2725_v44, 0.0 }
 0x5dc   : > { %966 = vadd.xlane.f32.xlu0 %v965_v45  ;;  %969 = vadd.xlane.f32.xlu1 %v968_v46 }
 0x5ed   : > { %1098 = vrot.lane.b32.xlu1 %v3029_v16, %s2788_s21 }
 0x5f1   : > { %1219 = vrot.lane.b32.xlu1 %v3029_v16, %s2789_s22 }
 0x5f2   : > { %977 = vrot.lane.b32.xlu0 %v3029_v16, %s2787_s28 }
 0x65d   : > { %v1089_v47 = vpop.xlane.xlu0 %1088 }
 0x661   : > { %v1092_v48 = vpop.xlane.xlu1 %1091 }
 0x665   : > { %v1210_v49 = vpop.xlane.xlu0 %1209  ;;  %v1213_v50 = vpop.xlane.xlu1 %1212 }
 0x669   : > { %v967_v51 = vpop.xlane.xlu0 %966  ;;  %v970_v53 = vpop.xlane.xlu1 %969 }
 0x66a   : > { %2726 = vrcp.f32 %v967_v51 }
 0x66b   : > { %2728 = vrcp.f32 %v970_v53 }
 0x66c   : > { %2730 = vrcp.f32 %v1092_v48 }
 0x66d   : > { %v978_v54 = vpop.permute.xlu0 %977  ;;  %2732 = vrcp.f32 %v1089_v47  ;;  %v1099_v1 = vpop.permute.xlu1 %1098 }
 0x66e   : > { %2488 = vmatpush3.bf16.msra.mxu1 %v978_v54  ;;  %2734 = vrcp.f32 %v1210_v49  ;;  %v2287_v54 = vld [vmem:[%s3397_s6] ss:$0 sm:$0xff] }
 0x66f   : > { %2499 = vmatprep.subr.bf16.mxu1 %v2784_v6  ;;  %2736 = vrcp.f32 %v1213_v50 }
 0x671   : > { %v1220_v9 = vpop.permute.xlu1 %1219 }
 0x674   : > { %v2727_v59 = vpop.eup %2726 }
 0x675   : > { %v2729_v61 = vpop.eup %2728  ;;  %v973_v62 = vmul.f32 %v2727_v59, %v2723_v41 }
 0x676   : > { %v974_v63 = vmul.f32 %v2729_v61, %v2725_v44  ;;  %v2731_v0 = vpop.eup %2730 }
 0x677   : > { %v2733_v2 = vpop.eup %2732  ;;  %v1096_v3 = vmul.f32 %v2731_v0, %v2717_v37 }
 0x678   : > { %v975_v16 = vpack.c.bf16 %v974_v63, %v973_v62  ;;  %v1095_v4 = vmul.f32 %v2733_v2, %v2715_v35  ;;  %v2735_v5 = vpop.eup %2734 }
 0x679   : > { %v2737_v8 = vpop.eup %2736  ;;  %v1216_v10 = vmul.f32 %v2735_v5, %v2721_v40  ;;  %v2627_v5 = vld [vmem:[%s3400_s9 + $0xc] ss:$16 sps:$4 sm:$0xff]  }
 0x67a   : > { %2490 = vmatmul.mubr.msk.bf16.vlgmr.msra.gmra.mrb[16].mxu1 %vm832_vm2, %v975_v16  ;;  %v1097_v7 = vpack.c.bf16 %v1096_v3, %v1095_v4  ;;  %v1217_v11 = vmul.f32 %v2737_v8, %v2719_v39  ;;  %v2624_v3 = vld [vmem:[%s3400_s9 + $0x4] ss:$16 sps:$4 sm:$0xff]   ;;  %v2625_v4 = vld [vmem:[%s3400_s9 + $0x8] ss:$16 sps:$4 sm:$0xff]   ;;  %v2633_v8 = vld [vmem:[%s3400_s9 + $0x2c] ss:$16 sps:$4 sm:$0xff]   ;;  %1711 = vmatprep.subr.bf16.mxu0 %v2627_v5 }
 0x67b   : > { %2500 = vmatpush3.bf16.msra.mxu1 %v1099_v1  ;;  %2501 = vmatprep.mubr.msk.bf16.mxu1 %vm2786_vm0, %v2784_v6  ;;  %v2759_v1 = vld [vmem:[%s2906_s14 + $0x8] sm:$0xff] }
 0x67c   : > { %2511 = vmatprep.subr.bf16.mxu1 %v2784_v6  ;;  %v1218_v12 = vpack.c.bf16 %v1217_v11, %v1216_v10  ;;  %v2631_v10 = vld [vmem:[%s3400_s9 + $0x28] ss:$16 sps:$4 sm:$0xff]  }
 0x67d   : > { %v2674_v5 = vld [vmem:[%s3402_s11 + $0x48] sm:$0xff]  }
 0x682   : > { %2502 = vmatmul.mubr.msk.bf16.vlgmr.msra.gmra.mrb[20].mxu1 %vm832_vm2, %v1097_v7  ;;  %v2630_v7 = vld [vmem:[%s3400_s9 + $0x24] ss:$16 sps:$4 sm:$0xff]  }
 0x683   : > { %2512 = vmatpush3.bf16.msra.mxu1 %v1220_v9  ;;  %2513 = vmatprep.mubr.msk.bf16.mxu1 %vm2786_vm0, %v2784_v6  ;;  %v2628_v9 = vld [vmem:[%s3400_s9 + $0x20] ss:$16 sps:$4 sm:$0xff]  }
 0x684   : > { %1668 = vmatprep.subr.bf16.mxu1 %v2624_v3  ;;  %v2672_v3 = vld [vmem:[%s3402_s11] sm:$0xff]  }
 0x68a   : > { %2514 = vmatmul.mubr.msk.bf16.vlgmr.msra.gmra.mrb[24].mxu1 %vm832_vm2, %v1218_v12 }
 0x68b   : > { %1700 = vmatprep.mubr.bf16.mxu1 %v2785_v32 }
 0x74d   : > { %v1017_v19 = vpop.f32.mrb[16].mxu1 }
 0x74e   : > { %v2491_v20 = vpop.f32.mrb[17].mxu1 }
 0x74f   : > { %v1020_v22 = vpop.f32.mrb[18].mxu1  ;;  %v2636_v20 = vld [vmem:[%s3400_s9 + $0x44] ss:$16 sps:$4 sm:$0xff]  }
 0x750   : > { %v2567_v23 = vpack.i.bf16 %v1020_v22, %v1017_v19  ;;  %v2492_v24 = vpop.f32.mrb[19].mxu1  ;;  %v2634_v22 = vld [vmem:[%s3400_s9 + $0x40] ss:$16 sps:$4 sm:$0xff]  }
 0x751   : > { %v2642_v24 = vld [vmem:[%s3400_s9 + $0x64] ss:$16 sps:$4 sm:$0xff]  }
 0x752   : > { %2568 = vrot.lane.b32.xlu1 %v2567_v23, %s2789_s22  ;;  %v2637_v23 = vld [vmem:[%s3400_s9 + $0x48] ss:$16 sps:$4 sm:$0xff]  }
 0x755   : > { %v1138_v26 = vpop.f32.mrb[20].mxu1 }
 0x756   : > { %v2503_v27 = vpop.f32.mrb[21].mxu1 }
 0x757   : > { %v1141_v29 = vpop.f32.mrb[22].mxu1  ;;  %v2643_v27 = vld [vmem:[%s3400_s9 + $0x68] ss:$16 sps:$4 sm:$0xff]  }
 0x758   : > { %v2572_v30 = vpack.i.bf16 %v1141_v29, %v1138_v26  ;;  %v2504_v31 = vpop.f32.mrb[23].mxu1  ;;  %v2640_v26 = vld [vmem:[%s3400_s9 + $0x60] ss:$16 sps:$4 sm:$0xff]   ;;  %v2651_v29 = vld [vmem:[%s3400_s9 + $0x8c] ss:$16 sps:$4 sm:$0xff]  }
 0x759   : > { %v2649_v31 = vld [vmem:[%s3400_s9 + $0x88] ss:$16 sps:$4 sm:$0xff]  }
 0x75a   : > { %2573 = vrot.lane.b32.xlu0 %v2572_v30, %s2788_s21  ;;  %v2646_v30 = vld [vmem:[%s3400_s9 + $0x80] ss:$16 sps:$4 sm:$0xff]  }
 0x75d   : > { %v1259_v33 = vpop.f32.mrb[24].mxu1 }
 0x75e   : > { %v2515_v34 = vpop.f32.mrb[25].mxu1 }
 0x75f   : > { %v1262_v35 = vpop.f32.mrb[26].mxu1  ;;  %v2657_v34 = vld [vmem:[%s3400_s9 + $0xac] ss:$16 sps:$4 sm:$0xff]  }
 0x760   : > { %v2577_v36 = vpack.i.bf16 %v1262_v35, %v1259_v33  ;;  %v2516_v37 = vpop.f32.mrb[27].mxu1  ;;  %v2654_v33 = vld [vmem:[%s3400_s9 + $0xa4] ss:$16 sps:$4 sm:$0xff]   ;;  %v2652_v35 = vld [vmem:[%s3400_s9 + $0xa0] ss:$16 sps:$4 sm:$0xff]  }
 0x761   : > { %v2660_v37 = vld [vmem:[%s3400_s9 + $0xc4] ss:$16 sps:$4 sm:$0xff]  }
 0x762   : > { %2578 = vrot.lane.b32.xlu1 %v2577_v36, %s2787_s28  ;;  %v2655_v36 = vld [vmem:[%s3400_s9 + $0xa8] ss:$16 sps:$4 sm:$0xff]   ;;  %s2151_s28 = scalar_lea.vmem (%p2890_p5), %s3404_s13, %s2368_s23 }
 0x7c4   : > { %v2569_v38 = vpop.permute.xlu1 %2568 }
 0x7c5   : > { %v2571_v39 = vunpack.i.h.bf16 %v2569_v38  ;;  %v2570_v40 = vunpack.i.l.bf16 %v2569_v38  ;;  %v2663_v38 = vld [vmem:[%s3400_s9 + $0xcc] ss:$16 sps:$4 sm:$0xff]  }
 0x7c7   : > { %v1291_v44 = vsel %vm784_vm1, %v3068_v55, %v2571_v39  ;;  %v1290_v45 = vsel %vm784_vm1, %v3066_v52, %v2570_v40  ;;  %v2758_v52 = vld [vmem:[%s2906_s14] sm:$0xff]  ;;  %v2661_v39 = vld [vmem:[%s3400_s9 + $0xc8] ss:$16 sps:$4 sm:$0xff]  }
 0x7c8   : > { %v2666_v40 = vld [vmem:[%s3400_s9 + $0xe4] ss:$16 sps:$4 sm:$0xff]  }
 0x7cc   : > { %v2574_v6 = vpop.permute.xlu0 %2573 }
 0x7cd   : > { %v2576_v41 = vunpack.i.h.bf16 %v2574_v6  ;;  %v2575_v42 = vunpack.i.l.bf16 %v2574_v6  ;;  %v2658_v6 = vld [vmem:[%s3400_s9 + $0xc0] ss:$16 sps:$4 sm:$0xff]  }
 0x7cf   : > { %v1294_v48 = vsel %vm1292_vm3, %v1291_v44, %v2576_v41  ;;  %v1293_v49 = vsel %vm1292_vm3, %v1290_v45, %v2575_v42  ;;  %v2669_v41 = vld [vmem:[%s3400_s9 + $0xec] ss:$16 sps:$4 sm:$0xff]   ;;  %v2664_v42 = vld [vmem:[%s3400_s9 + $0xe0] ss:$16 sps:$4 sm:$0xff]  }
 0x7d4   : > { %v2579_v43 = vpop.permute.xlu1 %2578 }
 0x7d5   : > { %v2581_v46 = vunpack.i.h.bf16 %v2579_v43  ;;  %v2580_v47 = vunpack.i.l.bf16 %v2579_v43  ;;  %v2667_v43 = vld [vmem:[%s3400_s9 + $0xe8] ss:$16 sps:$4 sm:$0xff]  }
 0x7d7   : > { %v1297_v50 = vsel %vm1295_vm4, %v1294_v48, %v2581_v46  ;;  %v1296_v51 = vsel %vm1295_vm4, %v1293_v49, %v2580_v47 }
 0x7d8   : > { %v1298_v53 = vpack.c.bf16 %v1297_v50, %v1296_v51 }
 0x7da   : > { %2534 = vmatmul.mubr.bf16.vlgmr.msra.gmra.mrb[12].mxu0 %v1298_v53  ;;  %v2296_v53 = vld [vmem:[%s3398_s7] ss:$0 sm:$0xff] }
 0x7db   : > { %1743 = vmatprep.mubr.bf16.mxu0 %v2785_v32  ;;  %v2622_v32 = vld [vmem:[%s3400_s9] ss:$16 sps:$4 sm:$0xff]   ;;  %1712 = vmatpush1.bf16.msra.mxu0 %v2625_v4 }
 0x7dc   : > { %1669 = vmatpush1.bf16.msra.mxu1 %v2622_v32  ;;  %1713 = vmatprep.subr.bf16.mxu0 %v2633_v8  ;;  %v2671_v32 = vld [vmem:[%s3402_s11 + $0xc0] sm:$0xff]   ;;  %v2676_v8 = vld [vmem:[%s3402_s11 + $0x8] sm:$0xff]  }
 0x7dd   : > { %1670 = vmatprep.subr.bf16.mxu1 %v2630_v7  ;;  %v2673_v4 = vld [vmem:[%s3402_s11 + $0x80] sm:$0xff]   ;;  %v2675_v7 = vld [vmem:[%s3402_s11 + $0xc8] sm:$0xff]  }
 0x7df   : > { %1714 = vmatpush1.bf16.msra.mxu0 %v2631_v10  ;;  %v2678_v10 = vld [vmem:[%s3402_s11 + $0x50] sm:$0xff]  }
 0x7e0   : > { %1671 = vmatpush1.bf16.msra.mxu1 %v2628_v9  ;;  %1715 = vmatprep.subr.bf16.mxu0 %v2639_v21  ;;  %v2677_v9 = vld [vmem:[%s3402_s11 + $0x88] sm:$0xff]   ;;  %v2688_v21 = vld [vmem:[%s3402_s11 + $0x20] sm:$0xff]  }
 0x7e1   : > { %1672 = vmatprep.subr.bf16.mxu1 %v2636_v20  ;;  %v2687_v20 = vld [vmem:[%s3402_s11 + $0xe0] sm:$0xff]  }
 0x7e3   : > { %1716 = vmatpush1.bf16.msra.mxu0 %v2637_v23  ;;  %v2690_v23 = vld [vmem:[%s3402_s11 + $0x68] sm:$0xff]  }
 0x7e4   : > { %1673 = vmatpush1.bf16.msra.mxu1 %v2634_v22  ;;  %1717 = vmatprep.subr.bf16.mxu0 %v2645_v25  ;;  %v2689_v22 = vld [vmem:[%s3402_s11 + $0xa0] sm:$0xff]   ;;  %v2692_v25 = vld [vmem:[%s3402_s11 + $0x28] sm:$0xff]  }
 0x7e5   : > { %1674 = vmatprep.subr.bf16.mxu1 %v2642_v24  ;;  %v2691_v24 = vld [vmem:[%s3402_s11 + $0xe8] sm:$0xff]  }
 0x7e7   : > { %1718 = vmatpush1.bf16.msra.mxu0 %v2643_v27  ;;  %v2694_v27 = vld [vmem:[%s3402_s11 + $0x70] sm:$0xff]  }
 0x7e8   : > { %1675 = vmatpush1.bf16.msra.mxu1 %v2640_v26  ;;  %1719 = vmatprep.subr.bf16.mxu0 %v2651_v29  ;;  %v2693_v26 = vld [vmem:[%s3402_s11 + $0xa8] sm:$0xff]   ;;  %v2696_v29 = vld [vmem:[%s3402_s11 + $0x30] sm:$0xff]  }
 0x7e9   : > { %1676 = vmatprep.subr.bf16.mxu1 %v2648_v28  ;;  %v2695_v28 = vld [vmem:[%s3402_s11 + $0xf0] sm:$0xff]  }
 0x7eb   : > { %1720 = vmatpush1.bf16.msra.mxu0 %v2649_v31  ;;  %v2698_v31 = vld [vmem:[%s3402_s11 + $0x78] sm:$0xff]  }
 0x7ec   : > { %1677 = vmatpush1.bf16.msra.mxu1 %v2646_v30  ;;  %1721 = vmatprep.subr.bf16.mxu0 %v2657_v34  ;;  %v2697_v30 = vld [vmem:[%s3402_s11 + $0xb0] sm:$0xff]   ;;  %v2700_v34 = vld [vmem:[%s3402_s11 + $0x38] sm:$0xff]  }
 0x7ed   : > { %1678 = vmatprep.subr.bf16.mxu1 %v2654_v33  ;;  %v2699_v33 = vld [vmem:[%s3402_s11 + $0xf8] sm:$0xff]  }
 0x7ef   : > { %1722 = vmatpush1.bf16.msra.mxu0 %v2655_v36  ;;  %v1486_v36 = vld [vmem:[%s3401_s10] sm:$0xf] }
 0x7f0   : > { %1679 = vmatpush1.bf16.msra.mxu1 %v2652_v35  ;;  %1723 = vmatprep.subr.bf16.mxu0 %v2663_v38  ;;  %v2701_v35 = vld [vmem:[%s3402_s11 + $0xb8] sm:$0xff]   ;;  %v1491_v38 = vrot.slane %v1486_v36, %v556_v57 }
 0x7f1   : > { %1680 = vmatprep.subr.bf16.mxu1 %v2660_v37  ;;  %v1502_v37 = vsub.s32 3, %v3015_v56 }
 0x7f3   : > { %1724 = vmatpush1.bf16.msra.mxu0 %v2661_v39 }
 0x7f4   : > { %1681 = vmatpush1.bf16.msra.mxu1 %v2658_v6  ;;  %1725 = vmatprep.subr.bf16.mxu0 %v2669_v41  ;;  %v1499_v6 = vrot.slane %v1486_v36, %v564_v58  ;;  %v1495_v41 = vrot.slane %v1486_v36, %v560_v60 }
 0x7f5   : > { %1682 = vmatprep.subr.bf16.mxu1 %v2666_v40 }
 0x7f7   : > { %1726 = vmatpush1.bf16.msra.mxu0 %v2667_v43 }
 0x7f8   : > { %1683 = vmatpush1.bf16.msra.mxu1 %v2664_v42  ;;  %2427 = vmatprep.subr.bf16.mxu0 %v2671_v32  ;;  %v1503_v42 = vrot.slane %v1486_v36, %v1502_v37 }
 0x8ad   : > { %v1404_v55 = vpop.f32.mrb[12].mxu0 }
 0x8ae   : > { %v1405_v59 = vadd.f32 %v2287_v54, %v1404_v55  ;;  %v2535_v61 = vpop.f32.mrb[13].mxu0 }
 0x8af   : > { %v1407_v62 = vpop.f32.mrb[14].mxu0  ;;  %v2297_v61 = vld [vmem:[%s3399_s8] ss:$0 sm:$0xff] }
 0x8b0   : > { %v3141_v63 = vadd.f32 %v2758_v52, %v1405_v59  ;;  %v1408_v16 = vadd.f32 %v2287_v54, %v1407_v62  ;;  %v2536_v0 = vpop.f32.mrb[15].mxu0 }
 0x8b2   : > { %v3144_v2 = vadd.f32 %v2759_v1, %v1408_v16  ;;  %1413 = vadd.xlane.f32.xlu0 %v3141_v63  ;;  %v2670_v1 = vld [vmem:[%s3402_s11 + $0x40] sm:$0xff]  }
 0x8b3   : > { %2405 = vmatprep.subr.bf16.mxu1 %v2670_v1 }
 0x8b4   : > { %1415 = vadd.xlane.f32.xlu1 %v3144_v2 }
 0x93f   : > { %v1414_v11 = vpop.xlane.xlu0 %1413 }
 0x940   : > { %v1417_v12 = vmul.f32 0.0078125, %v1414_v11  ;;  %v2679_v11 = vld [vmem:[%s3402_s11 + $0xd0] sm:$0xff]  }
 0x941   : > { %v1416_v13 = vpop.xlane.xlu1 %1415 }
 0x942   : > { %v3173_v14 = vsub.f32 %v3141_v63, %v1417_v12  ;;  %v1418_v15 = vmul.f32 0.0078125, %v1416_v13  ;;  %v2680_v12 = vld [vmem:[%s3402_s11 + $0x10] sm:$0xff]  }
 0x943   : > { %v2681_v13 = vld [vmem:[%s3402_s11 + $0x90] sm:$0xff]  }
 0x944   : > { %v3176_v17 = vsub.f32 %v3144_v2, %v1418_v15  ;;  %v1421_v18 = vmul.f32 %v3173_v14, %v3173_v14  ;;  %v2683_v15 = vld [vmem:[%s3402_s11 + $0xd8] sm:$0xff]  }
 0x946   : > { %1423 = vadd.xlane.f32.xlu0 %v1421_v18  ;;  %v1422_v19 = vmul.f32 %v3176_v17, %v3176_v17  ;;  %v2685_v18 = vld [vmem:[%s3402_s11 + $0x98] sm:$0xff]  }
 0x94a   : > { %1425 = vadd.xlane.f32.xlu0 %v1422_v19  ;;  %v2686_v19 = vld [vmem:[%s3402_s11 + $0x60] sm:$0xff]  }
 0x9d3   : > { %v1424_v44 = vpop.xlane.xlu0 %1423 }
 0x9d4   : > { %v1427_v45 = vmul.f32 0.0078125, %v1424_v44 }
 0x9d6   : > { %v1429_v46 = vadd.f32 1e-05, %v1427_v45 }
 0x9d7   : > { %v1426_v47 = vpop.xlane.xlu0 %1425 }
 0x9d8   : > { %2738 = vrsqrt.f32 %v1429_v46  ;;  %v1428_v48 = vmul.f32 0.0078125, %v1426_v47 }
 0x9da   : > { %v1430_v49 = vadd.f32 1e-05, %v1428_v48 }
 0x9dc   : > { %2740 = vrsqrt.f32 %v1430_v49 }
 0x9e2   : > { %v2739_v50 = vpop.eup %2738 }
 0x9e3   : > { %v1433_v51 = vmul.f32 %v2739_v50, %v3173_v14  ;;  %v2682_v14 = vld [vmem:[%s3402_s11 + $0x58] sm:$0xff]  }
 0x9e5   : > { %v1442_v59 = vmul.f32 %v2296_v53, %v1433_v51 }
 0x9e6   : > { %v2741_v54 = vpop.eup %2740 }
 0x9e7   : > { %v1434_v55 = vmul.f32 %v2741_v54, %v3176_v17  ;;  %v1451_v52 = vadd.f32 %v2297_v61, %v1442_v59  ;;  %v2684_v17 = vld [vmem:[%s3402_s11 + $0x18] sm:$0xff]  }
 0x9e9   : > { %v1443_v62 = vmul.f32 %v2296_v53, %v1434_v55 }
 0x9eb   : > { %v1452_v16 = vadd.f32 %v2297_v61, %v1443_v62 }
 0x9ed   : > { %v1453_v0 = vpack.c.bf16 %v1452_v16, %v1451_v52 }
 0x9ef   : > { %1701 = vmatmul.mubr.bf16.vlgmr.msra.gmra.mrb[28].mxu1 %v1453_v0  ;;  %1744 = vmatmul.mubr.bf16.vlgmr.msra.gmra.mrb[16].mxu0 %v1453_v0 }
 0x9f0   : > { %2406 = vmatpush3.bf16.msra.mxu1 %v2672_v3  ;;  %2428 = vmatpush3.bf16.msra.mxu0 %v2673_v4 }
 0x9f1   : > { %2407 = vmatprep.subr.bf16.mxu1 %v2674_v5  ;;  %2429 = vmatprep.subr.bf16.mxu0 %v2675_v7 }
 0x9f4   : > { %2408 = vmatpush3.bf16.msra.mxu1 %v2676_v8  ;;  %2430 = vmatpush3.bf16.msra.mxu0 %v2677_v9 }
 0x9f5   : > { %2409 = vmatprep.subr.bf16.mxu1 %v2678_v10  ;;  %2431 = vmatprep.subr.bf16.mxu0 %v2679_v11 }
 0x9f8   : > { %2410 = vmatpush3.bf16.msra.mxu1 %v2680_v12  ;;  %2432 = vmatpush3.bf16.msra.mxu0 %v2681_v13 }
 0x9f9   : > { %2411 = vmatprep.subr.bf16.mxu1 %v2682_v14  ;;  %2433 = vmatprep.subr.bf16.mxu0 %v2683_v15 }
 0x9fc   : > { %2412 = vmatpush3.bf16.msra.mxu1 %v2684_v17  ;;  %2434 = vmatpush3.bf16.msra.mxu0 %v2685_v18 }
 0x9fd   : > { %2413 = vmatprep.subr.bf16.mxu1 %v2686_v19  ;;  %2435 = vmatprep.subr.bf16.mxu0 %v2687_v20 }
 0xa00   : > { %2414 = vmatpush3.bf16.msra.mxu1 %v2688_v21  ;;  %2436 = vmatpush3.bf16.msra.mxu0 %v2689_v22 }
 0xa01   : > { %2415 = vmatprep.subr.bf16.mxu1 %v2690_v23  ;;  %2437 = vmatprep.subr.bf16.mxu0 %v2691_v24 }
 0xa04   : > { %2416 = vmatpush3.bf16.msra.mxu1 %v2692_v25  ;;  %2438 = vmatpush3.bf16.msra.mxu0 %v2693_v26 }
 0xa05   : > { %2417 = vmatprep.subr.bf16.mxu1 %v2694_v27  ;;  %2439 = vmatprep.subr.bf16.mxu0 %v2695_v28 }
 0xa08   : > { %2418 = vmatpush3.bf16.msra.mxu1 %v2696_v29  ;;  %2440 = vmatpush3.bf16.msra.mxu0 %v2697_v30  ;;  %v2334_v29 = vld [vmem:[%s3403_s12] ss:$0 sm:$0xff] }
 0xa09   : > { %2419 = vmatprep.subr.bf16.mxu1 %v2698_v31  ;;  %2441 = vmatprep.subr.bf16.mxu0 %v2699_v33 }
 0xa0c   : > { %2420 = vmatpush3.bf16.msra.mxu1 %v2700_v34  ;;  %2442 = vmatpush3.bf16.msra.mxu0 %v2701_v35 }
 0xac2   : > { %v1702_v39 = vpop.f32.mrb[28].mxu1  ;;  %v1745_v40 = vpop.f32.mrb[16].mxu0 }
 0xac3   : > { %v1704_v43 = vpop.f32.mrb[29].mxu1  ;;  %v1747_v44 = vpop.f32.mrb[17].mxu0  ;;  %v1703_v47 = vadd.f32 %v1702_v39, %v1491_v38  ;;  %v1746_v48 = vadd.f32 %v1745_v40, %v1499_v6 }
 0xac4   : > { %v1706_v45 = vpop.f32.mrb[30].mxu1  ;;  %v1749_v46 = vpop.f32.mrb[18].mxu0  ;;  %v1705_v57 = vadd.f32 %v1704_v43, %v1495_v41  ;;  %v1748_v54 = vadd.f32 %v1747_v44, %v1503_v42 }
 0xac5   : > { %v1707_v49 = vadd.f32 %v1706_v45, %v1491_v38  ;;  %v1750_v50 = vadd.f32 %v1749_v46, %v1499_v6  ;;  %v1708_v51 = vpop.f32.mrb[31].mxu1  ;;  %v1751_v53 = vpop.f32.mrb[19].mxu0 }
 0xac6   : > { %v1709_v55 = vadd.f32 %v1708_v51, %v1495_v41  ;;  %v1752_v58 = vadd.f32 %v1751_v53, %v1503_v42 }
 0xac7   : > { %v1754_v59 = vpack.c.bf16 %v1707_v49, %v1703_v47  ;;  %v1756_v61 = vpack.c.bf16 %v1750_v50, %v1746_v48 }
 0xac8   : > { %v1755_v62 = vpack.c.bf16 %v1709_v55, %v1705_v57  ;;  %v1757_v56 = vpack.c.bf16 %v1752_v58, %v1748_v54 }
 0xac9   : > { %v2330_v60 = vmul.bf16 3218784218, %v1754_v59  ;;  %v2332_v52 = vmul.bf16 3218784218, %v1756_v61 }
 0xaca   : > { %v2331_v16 = vmul.bf16 3218784218, %v1755_v62  ;;  %v2333_v0 = vmul.bf16 3218784218, %v1757_v56 }
 0xacb   : > { %v1767_v1 = vmul.bf16 1069105081, %v2330_v60  ;;  %v1773_v32 = vmul.bf16 1069105081, %v2332_v52 }
 0xacc   : > { %v1770_v3 = vmul.bf16 1069105081, %v2331_v16  ;;  %v1776_v4 = vmul.bf16 1069105081, %v2333_v0 }
 0xacd   : > { %2742 = vpow.bf16 %v1767_v1 }
 0xace   : > { %2744 = vpow.bf16 %v1773_v32 }
 0xacf   : > { %2746 = vpow.bf16 %v1770_v3 }
 0xad0   : > { %2748 = vpow.bf16 %v1776_v4 }
 0xad8   : > { %v2743_v5 = vpop.eup %2742 }
 0xad9   : > { %v2745_v7 = vpop.eup %2744  ;;  %v1778_v8 = vadd.bf16 1065369472, %v2743_v5 }
 0xada   : > { %v2747_v9 = vpop.eup %2746  ;;  %v1780_v10 = vadd.bf16 1065369472, %v2745_v7 }
 0xadb   : > { %v2749_v11 = vpop.eup %2748  ;;  %2750 = vrcp.bf16 %v1778_v8  ;;  %v1779_v12 = vadd.bf16 1065369472, %v2747_v9 }
 0xadc   : > { %2752 = vrcp.bf16 %v1780_v10  ;;  %v1781_v13 = vadd.bf16 1065369472, %v2749_v11 }
 0xadd   : > { %2754 = vrcp.bf16 %v1779_v12 }
 0xade   : > { %2756 = vrcp.bf16 %v1781_v13 }
 0xae6   : > { %v2751_v14 = vpop.eup %2750 }
 0xae7   : > { %v2753_v15 = vpop.eup %2752  ;;  %v1783_v18 = vmul.bf16 1065369472, %v2751_v14 }
 0xae8   : > { %v2755_v17 = vpop.eup %2754  ;;  %v1787_v20 = vmul.bf16 1065369472, %v2753_v15 }
 0xae9   : > { %v2757_v19 = vpop.eup %2756  ;;  %v1785_v21 = vmul.bf16 1065369472, %v2755_v17  ;;  %v1790_v24 = vmul.bf16 %v1783_v18, %v1754_v59 }
 0xaea   : > { %v1789_v22 = vmul.bf16 1065369472, %v2757_v19  ;;  %v1792_v26 = vmul.bf16 %v1787_v20, %v1756_v61 }
 0xaeb   : > { %v1791_v23 = vmul.bf16 %v1785_v21, %v1755_v62 }
 0xaec   : > { %v1793_v25 = vmul.bf16 %v1789_v22, %v1757_v56 }
 0xaed   : > { %2089 = vmatprep.mubr.bf16.mxu1 %v1791_v23 }
 0xaee   : > { %2130 = vmatprep.mubr.bf16.mxu0 %v1793_v25  ;;  %2090 = vmatmul.mubr.bf16.vlgmr.msra.gmra.mrb[32].mxu1 %v1790_v24 }
 0xaef   : > { %2131 = vmatmul.mubr.bf16.vlgmr.msra.gmra.mrb[20].mxu0 %v1792_v26 }
 0xbc1   : > { %v2421_v27 = vpop.f32.mrb[32].mxu1 }
 0xbc2   : > { %v2443_v28 = vpop.f32.mrb[20].mxu0  ;;  %v2422_v30 = vpop.f32.mrb[33].mxu1 }
 0xbc3   : > { %v2423_v31 = vadd.f32 %v2422_v30, %v2421_v27  ;;  %v2444_v33 = vpop.f32.mrb[21].mxu0  ;;  %v2424_v34 = vpop.f32.mrb[34].mxu1 }
 0xbc4   : > { %v2445_v35 = vadd.f32 %v2444_v33, %v2443_v28  ;;  %v2446_v36 = vpop.f32.mrb[22].mxu0  ;;  %v2425_v37 = vpop.f32.mrb[35].mxu1 }
 0xbc5   : > { %v2092_v38 = vadd.f32 %v2423_v31, %v2334_v29  ;;  %v2426_v6 = vadd.f32 %v2425_v37, %v2424_v34  ;;  %v2447_v39 = vpop.f32.mrb[23].mxu0 }
 0xbc6   : > { %v2448_v40 = vadd.f32 %v2447_v39, %v2446_v36 }
 0xbc7   : > { %v2133_v41 = vadd.f32 %v2445_v35, %v2092_v38  ;;  %v2095_v42 = vadd.f32 %v2426_v6, %v2334_v29  ;;  %2149 = sbr.rel (!%p2890_p5) target bundleno = 3030 (0xbd6), region = 114 }
 0xbc9   : > { %v2139_v43 = vadd.f32 %v2133_v41, %v3141_v63  ;;  %v2136_v44 = vadd.f32 %v2448_v40, %v2095_v42 }
 0xbcb   : > { %2141 = vst [vmem:[%s472_s20] sm:$0xff] %v2139_v43  ;;  %v2140_v45 = vadd.f32 %v2136_v44, %v3144_v2 }
 0xbcd   : > { %2142 = vst [vmem:[%s472_s20 + $0x8] sm:$0xff] %v2140_v45 }
 0xbd2   : > { %v2181_v46 = vld [vmem:[%s472_s20] sm:$0xff] }
 0xbd3   : > { %2182 = vst [vmem:[%s2151_s28] sm:$0xff] %v2181_v46 }
 0xbd4   : > { %v2183_v47 = vld [vmem:[%s472_s20 + $0x8] sm:$0xff] }
 0xbd5   : > { %2184 = vst [vmem:[%s2151_s28 + $0x20] sm:$0xff] %v2183_v47 }
 0xbd6 PF: > { %p20_p10 = scmp.ge.s32.totalorder %s2877_s29, 6   ;;  %s3408_s25 = smov %s2778_s26 }
 0xbd7   : > { %s3409_s26 = smov %s2888_s15  ;;  %s3410_s27 = smov %s2877_s29 }
 0xbd8   :  { %22 = sbr.rel (!%p20_p10) target bundleno = 2 (0x2), region = 183 }

</bundles_post_ra>
